<compile_context>
chip_gen: v6e
topology: v6e:2x2x1
jax: 0.10.0
libtpu: 0.0.40
codegen_flags: <defaults>
</compile_context>

<pallas_src>
import functools

import jax
import jax.numpy as jnp
from jax.experimental import pallas as pl
from jax.experimental.pallas import tpu as pltpu


# ------------------------------- helpers -------------------------------------

def _round_up(x, m):
    return (x + m - 1) // m * m


def _pick_tm(m):
    # 256-row token tiles keep (resident bf16 weights + double-buffered f32
    # activation tiles + f32 MLP hidden) under the default 32 MiB scoped VMEM
    # on every generation (v7x has only 64 MiB physical). Tiny problems fall
    # back to a single full, 8-aligned block.
    return min(256, _round_up(m, 8))


def _pad_rows(x, m_pad):
    m = x.shape[0]
    if m == m_pad:
        return x
    return jnp.pad(x, ((0, m_pad - m), (0, 0)))


_PARALLEL1 = pltpu.CompilerParams(dimension_semantics=("parallel",))
_PARALLEL2 = pltpu.CompilerParams(dimension_semantics=("parallel", "parallel"))


# ----------------------------- Pallas kernels ---------------------------------

def _normalize_kernel(x_ref, mean_ref, std_ref, o_ref):
    # (x - mean[c]) / std[c]; mean/std are per-channel scalars read from SMEM.
    c = pl.program_id(1)
    o_ref[...] = (x_ref[...] - mean_ref[c]) / std_ref[c]


def _linear_kernel(x_ref, w_ref, b_ref, o_ref):
    # o = x @ w + b ; w is bf16 (frozen), f32 accumulate on the MXU.
    o_ref[...] = (
        jnp.dot(x_ref[...].astype(jnp.bfloat16), w_ref[...],
                preferred_element_type=jnp.float32)
        + b_ref[...]
    )


def _ln_matmul_kernel(x_ref, g_ref, b_ref, w_ref, bias_ref, o_ref):
    # Fused LayerNorm(x) @ w + bias (used for LN1+QKV and LN_f+projector).
    x = x_ref[...]
    mu = jnp.mean(x, axis=-1, keepdims=True)
    var = jnp.mean((x - mu) ** 2, axis=-1, keepdims=True)
    n = (x - mu) * jax.lax.rsqrt(var + 1e-6) * g_ref[...] + b_ref[...]
    o_ref[...] = (
        jnp.dot(n.astype(jnp.bfloat16), w_ref[...],
                preferred_element_type=jnp.float32)
        + bias_ref[...]
    )


def _ln_mlp_res_kernel(x_ref, g_ref, b_ref, w1_ref, b1_ref, w2_ref, b2_ref,
                       ls_ref, o_ref):
    # Fused: o = x + LayerScale * MLP(LayerNorm(x))
    x = x_ref[...]
    mu = jnp.mean(x, axis=-1, keepdims=True)
    var = jnp.mean((x - mu) ** 2, axis=-1, keepdims=True)
    n = (x - mu) * jax.lax.rsqrt(var + 1e-6) * g_ref[...] + b_ref[...]
    h = jnp.dot(n.astype(jnp.bfloat16), w1_ref[...],
                preferred_element_type=jnp.float32) + b1_ref[...]
    # TODO(synk): HF Dinov2 uses exact-erf GELU; tanh approximation (EUP) here.
    h = jax.nn.gelu(h, approximate=True)
    m = jnp.dot(h.astype(jnp.bfloat16), w2_ref[...],
                preferred_element_type=jnp.float32) + b2_ref[...]
    o_ref[...] = x + m * ls_ref[...]


def _attn_block_kernel(qkv_ref, res_ref, wo_ref, bo_ref, ls_ref, o_ref,
                       *, nh, dh, scale):
    # One image per grid step: multi-head softmax(q k^T * scale) v, output
    # projection, LayerScale and residual add, fused. The output store is the
    # lane-dense [T, D] slab (heads merged before the projection matmul).
    D = nh * dh
    qkv = qkv_ref[0]                       # [T, 3D] f32
    # TODO(synk): for real sequence lengths (T ~ 1370) switch to a KV-tiled
    # online-softmax (flash) loop instead of materializing [T, T] per head.
    ctxs = []
    for hd in range(nh):
        q = qkv[:, hd * dh:(hd + 1) * dh].astype(jnp.bfloat16)
        k = qkv[:, D + hd * dh:D + (hd + 1) * dh].astype(jnp.bfloat16)
        v = qkv[:, 2 * D + hd * dh:2 * D + (hd + 1) * dh].astype(jnp.bfloat16)
        s = jax.lax.dot_general(q, k, (((1,), (1,)), ((), ())),
                                preferred_element_type=jnp.float32) * scale
        mx = jnp.max(s, axis=-1, keepdims=True)
        p = jnp.exp(s - mx)
        p = p * pl.reciprocal(jnp.sum(p, axis=-1, keepdims=True), approx=True)
        ctxs.append(jnp.dot(p.astype(jnp.bfloat16), v,
                            preferred_element_type=jnp.float32))
    ctx = jnp.concatenate(ctxs, axis=-1)                       # [T, D]
    proj = jnp.dot(ctx.astype(jnp.bfloat16), wo_ref[...],
                   preferred_element_type=jnp.float32) + bo_ref[...]
    o_ref[0] = res_ref[0] + proj * ls_ref[...]


# ----------------------------- Pallas wrappers --------------------------------

def normalize(image, mean, std):
    B, C, H, W = image.shape
    return pl.pallas_call(
        _normalize_kernel,
        out_shape=jax.ShapeDtypeStruct(image.shape, jnp.float32),
        grid=(B, C),
        in_specs=[
            pl.BlockSpec((1, 1, H, W), lambda b, c: (b, c, 0, 0)),
            pl.BlockSpec(memory_space=pltpu.MemorySpace.SMEM),
            pl.BlockSpec(memory_space=pltpu.MemorySpace.SMEM),
        ],
        out_specs=pl.BlockSpec((1, 1, H, W), lambda b, c: (b, c, 0, 0)),
        compiler_params=_PARALLEL2,
    )(image, mean, std)


def linear(x, w_bf16, b):
    m, k = x.shape
    n = w_bf16.shape[1]
    tm = _pick_tm(m)
    m_pad = _round_up(m, tm)
    out = pl.pallas_call(
        _linear_kernel,
        out_shape=jax.ShapeDtypeStruct((m_pad, n), jnp.float32),
        grid=(m_pad // tm,),
        in_specs=[
            pl.BlockSpec((tm, k), lambda i: (i, 0)),
            pl.BlockSpec((k, n), lambda i: (0, 0)),     # weight stays resident
            pl.BlockSpec((1, n), lambda i: (0, 0)),
        ],
        out_specs=pl.BlockSpec((tm, n), lambda i: (i, 0)),
        compiler_params=_PARALLEL1,
    )(_pad_rows(x, m_pad), w_bf16, b.reshape(1, n))
    return out[:m]


def ln_matmul(x, g, b, w_bf16, bias):
    m, d = x.shape
    n = w_bf16.shape[1]
    tm = _pick_tm(m)
    m_pad = _round_up(m, tm)
    out = pl.pallas_call(
        _ln_matmul_kernel,
        out_shape=jax.ShapeDtypeStruct((m_pad, n), jnp.float32),
        grid=(m_pad // tm,),
        in_specs=[
            pl.BlockSpec((tm, d), lambda i: (i, 0)),
            pl.BlockSpec((1, d), lambda i: (0, 0)),
            pl.BlockSpec((1, d), lambda i: (0, 0)),
            pl.BlockSpec((d, n), lambda i: (0, 0)),     # weight stays resident
            pl.BlockSpec((1, n), lambda i: (0, 0)),
        ],
        out_specs=pl.BlockSpec((tm, n), lambda i: (i, 0)),
        compiler_params=_PARALLEL1,
    )(_pad_rows(x, m_pad), g.reshape(1, d), b.reshape(1, d),
      w_bf16, bias.reshape(1, n))
    return out[:m]


def ln_mlp_res(x, g, b, w1, b1, w2, b2, ls):
    m, d = x.shape
    f = w1.shape[1]
    tm = _pick_tm(m)
    m_pad = _round_up(m, tm)
    out = pl.pallas_call(
        _ln_mlp_res_kernel,
        out_shape=jax.ShapeDtypeStruct((m_pad, d), jnp.float32),
        grid=(m_pad // tm,),
        in_specs=[
            pl.BlockSpec((tm, d), lambda i: (i, 0)),
            pl.BlockSpec((1, d), lambda i: (0, 0)),
            pl.BlockSpec((1, d), lambda i: (0, 0)),
            pl.BlockSpec((d, f), lambda i: (0, 0)),     # weights stay resident
            pl.BlockSpec((1, f), lambda i: (0, 0)),
            pl.BlockSpec((f, d), lambda i: (0, 0)),
            pl.BlockSpec((1, d), lambda i: (0, 0)),
            pl.BlockSpec((1, d), lambda i: (0, 0)),
        ],
        out_specs=pl.BlockSpec((tm, d), lambda i: (i, 0)),
        compiler_params=_PARALLEL1,
    )(_pad_rows(x, m_pad), g.reshape(1, d), b.reshape(1, d), w1,
      b1.reshape(1, f), w2, b2.reshape(1, d), ls.reshape(1, d))
    return out[:m]


def attn_block(qkv, res, wo, bo, ls, *, nh, dh, scale):
    B, T, n3 = qkv.shape
    D = nh * dh
    return pl.pallas_call(
        functools.partial(_attn_block_kernel, nh=nh, dh=dh, scale=scale),
        out_shape=jax.ShapeDtypeStruct((B, T, D), jnp.float32),
        grid=(B,),
        in_specs=[
            pl.BlockSpec((1, T, n3), lambda b: (b, 0, 0)),
            pl.BlockSpec((1, T, D), lambda b: (b, 0, 0)),
            pl.BlockSpec((D, D), lambda b: (0, 0)),     # wo stays resident
            pl.BlockSpec((1, D), lambda b: (0, 0)),
            pl.BlockSpec((1, D), lambda b: (0, 0)),
        ],
        out_specs=pl.BlockSpec((1, T, D), lambda b: (b, 0, 0)),
        compiler_params=_PARALLEL1,
    )(qkv, res, wo, bo.reshape(1, D), ls.reshape(1, D))


# --------------------------- parameter construction ---------------------------

CFG = dict(hidden=64, heads=2, layers=2, mlp=256, patch=8, channels=3)


def init_params(key, cfg, img_hw):
    D, C, P, F = cfg["hidden"], cfg["channels"], cfg["patch"], cfg["mlp"]
    H, W = img_hw
    T = (H // P) * (W // P) + 1  # patches + cls token
    keys = iter(jax.random.split(key, 128))

    def w(shape, scale=0.02, dtype=jnp.bfloat16):
        # Frozen encoder -> pre-cast matmul weights to bf16 once (MXU operands,
        # half the weight DMA/VMEM); accumulation stays f32 in the kernels.
        return (scale * jax.random.normal(next(keys), shape)).astype(dtype)

    def layer_params():
        return dict(
            ln1_g=jnp.ones((D,), jnp.float32), ln1_b=jnp.zeros((D,), jnp.float32),
            # q/k/v fused into one [D, 3D] weight: one read of the normalized
            # activations and a 3x wider MXU N dimension.
            wqkv=w((D, 3 * D)), bqkv=jnp.zeros((3 * D,), jnp.float32),
            wo=w((D, D)), bo=jnp.zeros((D,), jnp.float32),
            ls1=jnp.full((D,), 1.0, jnp.float32),          # LayerScale gamma_1
            ln2_g=jnp.ones((D,), jnp.float32), ln2_b=jnp.zeros((D,), jnp.float32),
            w1=w((D, F)), b1=jnp.zeros((F,), jnp.float32),
            w2=w((F, D)), b2=jnp.zeros((D,), jnp.float32),
            ls2=jnp.full((D,), 1.0, jnp.float32),          # LayerScale gamma_2
        )

    return dict(
        image_mean=jnp.array([0.485, 0.456, 0.406], jnp.float32),
        image_std=jnp.array([0.229, 0.224, 0.225], jnp.float32),
        patch_w=w((C * P * P, D)),                         # Conv2d(k=P, s=P) as matmul
        patch_b=jnp.zeros((D,), jnp.float32),
        cls_token=w((1, 1, D), dtype=jnp.float32),
        pos_emb=w((1, T, D), dtype=jnp.float32),
        ln_f_g=jnp.ones((D,), jnp.float32), ln_f_b=jnp.zeros((D,), jnp.float32),
        proj_w=w((D, D)),                                  # nn.Linear(1024,1024) analogue
        proj_b=w((D,), 0.01, jnp.float32),
        layers=[layer_params() for _ in range(cfg["layers"])],
    )


# -------------------------------- forward pass --------------------------------

def frozen_dinov2_encoder(image, params, cfg):
    B, C, H, W = image.shape
    D, P, nh = cfg["hidden"], cfg["patch"], cfg["heads"]
    dh = D // nh
    scale = 1.0 / (dh ** 0.5)

    # (x - mean)/std in one Pallas pass (per-channel scalars from SMEM).
    x = normalize(image, params["image_mean"], params["image_std"])
    # TODO(synk): fp16 quantization boundary kept as XLA glue (fuses with the
    # patchify transpose); fold in-kernel once f16 converts are guaranteed by
    # the local Mosaic build. Original runs the full encoder in fp16; here
    # internal math is f32 accumulate over bf16 MXU operands.
    x = x.astype(jnp.float16).astype(jnp.float32)

    # patch embedding: Conv2d(C, D, kernel=P, stride=P) as one tiled matmul
    Hn, Wn = H // P, W // P
    patches = (
        x.reshape(B, C, Hn, P, Wn, P)
        .transpose(0, 2, 4, 1, 3, 5)                       # (b, hi, wi, c, ph, pw)
        .reshape(B * Hn * Wn, C * P * P)
    )
    tok = linear(patches, params["patch_w"], params["patch_b"]).reshape(B, Hn * Wn, D)

    cls = jnp.broadcast_to(params["cls_token"], (B, 1, D))
    h = jnp.concatenate([cls, tok], axis=1) + params["pos_emb"]   # [B, T, D]
    T = h.shape[1]
    M = B * T

    for lp in params["layers"]:
        # (a) fused LayerNorm1 + QKV projection, tiled over tokens
        qkv = ln_matmul(h.reshape(M, D), lp["ln1_g"], lp["ln1_b"],
                        lp["wqkv"], lp["bqkv"]).reshape(B, T, 3 * D)
        # (b) fused multi-head attention + out-proj + LayerScale + residual
        h = attn_block(qkv, h, lp["wo"], lp["bo"], lp["ls1"],
                       nh=nh, dh=dh, scale=scale)
        # (c) fused LayerNorm2 + MLP + LayerScale + residual, tiled over tokens
        h = ln_mlp_res(h.reshape(M, D), lp["ln2_g"], lp["ln2_b"],
                       lp["w1"], lp["b1"], lp["w2"], lp["b2"],
                       lp["ls2"]).reshape(B, T, D)

    # final LayerNorm + projector Linear fused into one tiled kernel
    hint = ln_matmul(h.reshape(M, D), params["ln_f_g"], params["ln_f_b"],
                     params["proj_w"], params["proj_b"])
    return hint.reshape(B, T, D)


# ------------------------------------ main -------------------------------------

if __name__ == "__main__":
    key = jax.random.PRNGKey(0)
    k_img, k_par = jax.random.split(key)

    B, C, H, W = 2, 3, 16, 16
    image = jax.random.uniform(k_img, (B, C, H, W), dtype=jnp.float32)  # NCHW like PyTorch

    params = init_params(k_par, CFG, (H, W))

    fwd = jax.jit(functools.partial(frozen_dinov2_encoder, cfg=CFG))
    hint = jax.block_until_ready(fwd(image, params))

    T = (H // CFG["patch"]) * (W // CFG["patch"]) + 1
    assert hint.shape == (B, T, CFG["hidden"]), hint.shape
    assert hint.dtype == jnp.float32
    assert bool(jnp.all(jnp.isfinite(hint)))
    print("KERNEL_OK")
</pallas_src>

<mosaic_0001>
module attributes {stable_mosaic.version = 11 : i64} {
  func.func @_normalize_kernel(%arg0: i32, %arg1: i32, %arg2: memref<1x1x16x16xf32, #tpu.memory_space<vmem>>, %arg3: memref<3xf32, #tpu.memory_space<smem>>, %arg4: memref<3xf32, #tpu.memory_space<smem>>, %arg5: memref<1x1x16x16xf32, #tpu.memory_space<vmem>>) attributes {dimension_semantics = [#tpu.dimension_semantics<parallel>, #tpu.dimension_semantics<parallel>], iteration_bounds = array<i64: 2, 3>, scalar_prefetch = 0 : i64, scratch_operands = 0 : i64, tpu.core_type = #tpu.core_type<tc>, window_params = [{transform_indices = @transform_0, window_bounds = array<i64: 1, 1, 16, 16>}, {transform_indices = @transform_1, window_bounds = array<i64: 3>}, {transform_indices = @transform_2, window_bounds = array<i64: 3>}, {transform_indices = @transform_3, window_bounds = array<i64: 1, 1, 16, 16>}]} {
    %c0 = arith.constant 0 : index
    %c0_0 = arith.constant 0 : index
    %c0_1 = arith.constant 0 : index
    %c0_2 = arith.constant 0 : index
    %0 = vector.load %arg2[%c0, %c0_0, %c0_1, %c0_2] : memref<1x1x16x16xf32, #tpu.memory_space<vmem>>, vector<1x1x16x16xf32>
    %1 = arith.index_cast %arg1 : i32 to index
    %2 = memref.load %arg3[%1] : memref<3xf32, #tpu.memory_space<smem>>
    %3 = vector.broadcast %2 : f32 to vector<1x1x16x16xf32>
    %4 = arith.subf %0, %3 : vector<1x1x16x16xf32>
    %5 = arith.index_cast %arg1 : i32 to index
    %6 = memref.load %arg4[%5] : memref<3xf32, #tpu.memory_space<smem>>
    %7 = vector.broadcast %6 : f32 to vector<1x1x16x16xf32>
    %8 = arith.divf %4, %7 : vector<1x1x16x16xf32>
    %c0_3 = arith.constant 0 : index
    %c0_4 = arith.constant 0 : index
    %c0_5 = arith.constant 0 : index
    %c0_6 = arith.constant 0 : index
    %9 = vector.load %arg5[%c0_3, %c0_4, %c0_5, %c0_6] : memref<1x1x16x16xf32, #tpu.memory_space<vmem>>, vector<1x1x16x16xf32>
    tpu.vector_store %arg5[%c0_3, %c0_4, %c0_5, %c0_6], %8 {strides = array<i32>} : memref<1x1x16x16xf32, #tpu.memory_space<vmem>>, vector<1x1x16x16xf32>,
    return
  }
  func.func @transform_0(%arg0: i32, %arg1: i32) -> (i32, i32, i32, i32) {
    %c0_i32 = arith.constant 0 : i32
    %c0_i32_0 = arith.constant 0 : i32
    %c0_i32_1 = arith.constant 0 : i32
    return %arg0, %arg1, %c0_i32, %c0_i32_0 : i32, i32, i32, i32
  }
  func.func @transform_1(%arg0: i32, %arg1: i32) -> i32 {
    %c0_i32 = arith.constant 0 : i32
    %c0_i32_0 = arith.constant 0 : i32
    return %c0_i32 : i32
  }
  func.func @transform_2(%arg0: i32, %arg1: i32) -> i32 {
    %c0_i32 = arith.constant 0 : i32
    %c0_i32_0 = arith.constant 0 : i32
    return %c0_i32 : i32
  }
  func.func @transform_3(%arg0: i32, %arg1: i32) -> (i32, i32, i32, i32) {
    %c0_i32 = arith.constant 0 : i32
    %c0_i32_0 = arith.constant 0 : i32
    %c0_i32_1 = arith.constant 0 : i32
    return %arg0, %arg1, %c0_i32, %c0_i32_0 : i32, i32, i32, i32
  }
}

module attributes {stable_mosaic.version = 11 : i64} {
  func.func @_linear_kernel(%arg0: i32, %arg1: memref<8x192xf32, #tpu.memory_space<vmem>>, %arg2: memref<192x64xbf16, #tpu.memory_space<vmem>>, %arg3: memref<1x64xf32, #tpu.memory_space<vmem>>, %arg4: memref<8x64xf32, #tpu.memory_space<vmem>>) attributes {dimension_semantics = [#tpu.dimension_semantics<parallel>], iteration_bounds = array<i64: 1>, scalar_prefetch = 0 : i64, scratch_operands = 0 : i64, tpu.core_type = #tpu.core_type<tc>, window_params = [{transform_indices = @transform_0, window_bounds = array<i64: 8, 192>}, {pipeline_mode = #tpu.pipeline_mode<synchronous>, transform_indices = @transform_1, window_bounds = array<i64: 192, 64>}, {pipeline_mode = #tpu.pipeline_mode<synchronous>, transform_indices = @transform_2, window_bounds = array<i64: 1, 64>}, {transform_indices = @transform_3, window_bounds = array<i64: 8, 64>}]} {
    %c0 = arith.constant 0 : index
    %c0_0 = arith.constant 0 : index
    %0 = vector.load %arg1[%c0, %c0_0] : memref<8x192xf32, #tpu.memory_space<vmem>>, vector<8x192xf32>
    %1 = arith.truncf %0 : vector<8x192xf32> to vector<8x192xbf16>
    %c0_1 = arith.constant 0 : index
    %c0_2 = arith.constant 0 : index
    %2 = vector.load %arg2[%c0_1, %c0_2] : memref<192x64xbf16, #tpu.memory_space<vmem>>, vector<192x64xbf16>
    %cst = arith.constant dense<0.000000e+00> : vector<8x64xf32>
    %3 = tpu.matmul %1, %2, %cst {dimension_numbers = #tpu.dot_dimension_numbers<[1], [0], [0], [1], [0, 0, 1, 1], [], []>} : vector<8x192xbf16>, vector<192x64xbf16>, vector<8x64xf32> -> vector<8x64xf32>
    %c0_3 = arith.constant 0 : index
    %c0_4 = arith.constant 0 : index
    %4 = vector.load %arg3[%c0_3, %c0_4] : memref<1x64xf32, #tpu.memory_space<vmem>>, vector<1x64xf32>
    %5 = vector.broadcast %4 : vector<1x64xf32> to vector<8x64xf32>
    %6 = arith.addf %3, %5 : vector<8x64xf32>
    %c0_5 = arith.constant 0 : index
    %c0_6 = arith.constant 0 : index
    %7 = vector.load %arg4[%c0_5, %c0_6] : memref<8x64xf32, #tpu.memory_space<vmem>>, vector<8x64xf32>
    tpu.vector_store %arg4[%c0_5, %c0_6], %6 {strides = array<i32>} : memref<8x64xf32, #tpu.memory_space<vmem>>, vector<8x64xf32>,
    return
  }
  func.func @transform_0(%arg0: i32) -> (i32, i32) {
    %c0_i32 = arith.constant 0 : i32
    %c0_i32_0 = arith.constant 0 : i32
    return %arg0, %c0_i32 : i32, i32
  }
  func.func @transform_1(%arg0: i32) -> (i32, i32) {
    %c0_i32 = arith.constant 0 : i32
    %c0_i32_0 = arith.constant 0 : i32
    %c0_i32_1 = arith.constant 0 : i32
    return %c0_i32, %c0_i32_0 : i32, i32
  }
  func.func @transform_2(%arg0: i32) -> (i32, i32) {
    %c0_i32 = arith.constant 0 : i32
    %c0_i32_0 = arith.constant 0 : i32
    %c0_i32_1 = arith.constant 0 : i32
    return %c0_i32, %c0_i32_0 : i32, i32
  }
  func.func @transform_3(%arg0: i32) -> (i32, i32) {
    %c0_i32 = arith.constant 0 : i32
    %c0_i32_0 = arith.constant 0 : i32
    return %arg0, %c0_i32 : i32, i32
  }
}

module attributes {stable_mosaic.version = 11 : i64} {
  func.func @_ln_matmul_kernel(%arg0: i32, %arg1: memref<16x64xf32, #tpu.memory_space<vmem>>, %arg2: memref<1x64xf32, #tpu.memory_space<vmem>>, %arg3: memref<1x64xf32, #tpu.memory_space<vmem>>, %arg4: memref<64x192xbf16, #tpu.memory_space<vmem>>, %arg5: memref<1x192xf32, #tpu.memory_space<vmem>>, %arg6: memref<16x192xf32, #tpu.memory_space<vmem>>) attributes {dimension_semantics = [#tpu.dimension_semantics<parallel>], iteration_bounds = array<i64: 1>, scalar_prefetch = 0 : i64, scratch_operands = 0 : i64, tpu.core_type = #tpu.core_type<tc>, window_params = [{transform_indices = @transform_0, window_bounds = array<i64: 16, 64>}, {pipeline_mode = #tpu.pipeline_mode<synchronous>, transform_indices = @transform_1, window_bounds = array<i64: 1, 64>}, {pipeline_mode = #tpu.pipeline_mode<synchronous>, transform_indices = @transform_2, window_bounds = array<i64: 1, 64>}, {pipeline_mode = #tpu.pipeline_mode<synchronous>, transform_indices = @transform_3, window_bounds = array<i64: 64, 192>}, {pipeline_mode = #tpu.pipeline_mode<synchronous>, transform_indices = @transform_4, window_bounds = array<i64: 1, 192>}, {transform_indices = @transform_5, window_bounds = array<i64: 16, 192>}]} {
    %c0 = arith.constant 0 : index
    %c0_0 = arith.constant 0 : index
    %0 = vector.load %arg1[%c0, %c0_0] : memref<16x64xf32, #tpu.memory_space<vmem>>, vector<16x64xf32>
    %cst = arith.constant dense<0.000000e+00> : vector<16xf32>
    %1 = vector.multi_reduction <add>, %0, %cst [1] : vector<16x64xf32> to vector<16xf32>
    %2 = vector.shape_cast %1 : vector<16xf32> to vector<16x1xf32>
    %cst_1 = arith.constant 6.400000e+01 : f32
    %3 = vector.broadcast %cst_1 : f32 to vector<16x1xf32>
    %4 = arith.divf %2, %3 : vector<16x1xf32>
    %5 = vector.broadcast %4 : vector<16x1xf32> to vector<16x64xf32>
    %6 = arith.subf %0, %5 : vector<16x64xf32>
    %7 = arith.mulf %6, %6 : vector<16x64xf32>
    %cst_2 = arith.constant dense<0.000000e+00> : vector<16xf32>
    %8 = vector.multi_reduction <add>, %7, %cst_2 [1] : vector<16x64xf32> to vector<16xf32>
    %9 = vector.shape_cast %8 : vector<16xf32> to vector<16x1xf32>
    %cst_3 = arith.constant 6.400000e+01 : f32
    %10 = vector.broadcast %cst_3 : f32 to vector<16x1xf32>
    %11 = arith.divf %9, %10 : vector<16x1xf32>
    %12 = vector.broadcast %4 : vector<16x1xf32> to vector<16x64xf32>
    %13 = arith.subf %0, %12 : vector<16x64xf32>
    %cst_4 = arith.constant 9.99999997E-7 : f32
    %14 = vector.broadcast %cst_4 : f32 to vector<16x1xf32>
    %15 = arith.addf %11, %14 : vector<16x1xf32>
    %16 = math.rsqrt %15 : vector<16x1xf32>
    %17 = vector.broadcast %16 : vector<16x1xf32> to vector<16x64xf32>
    %18 = arith.mulf %13, %17 : vector<16x64xf32>
    %c0_5 = arith.constant 0 : index
    %c0_6 = arith.constant 0 : index
    %19 = vector.load %arg2[%c0_5, %c0_6] : memref<1x64xf32, #tpu.memory_space<vmem>>, vector<1x64xf32>
    %20 = vector.broadcast %19 : vector<1x64xf32> to vector<16x64xf32>
    %21 = arith.mulf %18, %20 : vector<16x64xf32>
    %c0_7 = arith.constant 0 : index
    %c0_8 = arith.constant 0 : index
    %22 = vector.load %arg3[%c0_7, %c0_8] : memref<1x64xf32, #tpu.memory_space<vmem>>, vector<1x64xf32>
    %23 = vector.broadcast %22 : vector<1x64xf32> to vector<16x64xf32>
    %24 = arith.addf %21, %23 : vector<16x64xf32>
    %25 = arith.truncf %24 : vector<16x64xf32> to vector<16x64xbf16>
    %c0_9 = arith.constant 0 : index
    %c0_10 = arith.constant 0 : index
    %26 = vector.load %arg4[%c0_9, %c0_10] : memref<64x192xbf16, #tpu.memory_space<vmem>>, vector<64x192xbf16>
    %cst_11 = arith.constant dense<0.000000e+00> : vector<16x192xf32>
    %27 = tpu.matmul %25, %26, %cst_11 {dimension_numbers = #tpu.dot_dimension_numbers<[1], [0], [0], [1], [0, 0, 1, 1], [], []>} : vector<16x64xbf16>, vector<64x192xbf16>, vector<16x192xf32> -> vector<16x192xf32>
    %c0_12 = arith.constant 0 : index
    %c0_13 = arith.constant 0 : index
    %28 = vector.load %arg5[%c0_12, %c0_13] : memref<1x192xf32, #tpu.memory_space<vmem>>, vector<1x192xf32>
    %29 = vector.broadcast %28 : vector<1x192xf32> to vector<16x192xf32>
    %30 = arith.addf %27, %29 : vector<16x192xf32>
    %c0_14 = arith.constant 0 : index
    %c0_15 = arith.constant 0 : index
    %31 = vector.load %arg6[%c0_14, %c0_15] : memref<16x192xf32, #tpu.memory_space<vmem>>, vector<16x192xf32>
    tpu.vector_store %arg6[%c0_14, %c0_15], %30 {strides = array<i32>} : memref<16x192xf32, #tpu.memory_space<vmem>>, vector<16x192xf32>,
    return
  }
  func.func @transform_0(%arg0: i32) -> (i32, i32) {
    %c0_i32 = arith.constant 0 : i32
    %c0_i32_0 = arith.constant 0 : i32
    return %arg0, %c0_i32 : i32, i32
  }
  func.func @transform_1(%arg0: i32) -> (i32, i32) {
    %c0_i32 = arith.constant 0 : i32
    %c0_i32_0 = arith.constant 0 : i32
    %c0_i32_1 = arith.constant 0 : i32
    return %c0_i32, %c0_i32_0 : i32, i32
  }
  func.func @transform_2(%arg0: i32) -> (i32, i32) {
    %c0_i32 = arith.constant 0 : i32
    %c0_i32_0 = arith.constant 0 : i32
    %c0_i32_1 = arith.constant 0 : i32
    return %c0_i32, %c0_i32_0 : i32, i32
  }
  func.func @transform_3(%arg0: i32) -> (i32, i32) {
    %c0_i32 = arith.constant 0 : i32
    %c0_i32_0 = arith.constant 0 : i32
    %c0_i32_1 = arith.constant 0 : i32
    return %c0_i32, %c0_i32_0 : i32, i32
  }
  func.func @transform_4(%arg0: i32) -> (i32, i32) {
    %c0_i32 = arith.constant 0 : i32
    %c0_i32_0 = arith.constant 0 : i32
    %c0_i32_1 = arith.constant 0 : i32
    return %c0_i32, %c0_i32_0 : i32, i32
  }
  func.func @transform_5(%arg0: i32) -> (i32, i32) {
    %c0_i32 = arith.constant 0 : i32
    %c0_i32_0 = arith.constant 0 : i32
    return %arg0, %c0_i32 : i32, i32
  }
}

module attributes {stable_mosaic.version = 11 : i64} {
  func.func @_attn_block_kernel(%arg0: i32, %arg1: memref<1x5x192xf32, #tpu.memory_space<vmem>>, %arg2: memref<1x5x64xf32, #tpu.memory_space<vmem>>, %arg3: memref<64x64xbf16, #tpu.memory_space<vmem>>, %arg4: memref<1x64xf32, #tpu.memory_space<vmem>>, %arg5: memref<1x64xf32, #tpu.memory_space<vmem>>, %arg6: memref<1x5x64xf32, #tpu.memory_space<vmem>>) attributes {dimension_semantics = [#tpu.dimension_semantics<parallel>], iteration_bounds = array<i64: 2>, scalar_prefetch = 0 : i64, scratch_operands = 0 : i64, tpu.core_type = #tpu.core_type<tc>, window_params = [{transform_indices = @transform_0, window_bounds = array<i64: 1, 5, 192>}, {transform_indices = @transform_1, window_bounds = array<i64: 1, 5, 64>}, {pipeline_mode = #tpu.pipeline_mode<synchronous>, transform_indices = @transform_2, window_bounds = array<i64: 64, 64>}, {pipeline_mode = #tpu.pipeline_mode<synchronous>, transform_indices = @transform_3, window_bounds = array<i64: 1, 64>}, {pipeline_mode = #tpu.pipeline_mode<synchronous>, transform_indices = @transform_4, window_bounds = array<i64: 1, 64>}, {transform_indices = @transform_5, window_bounds = array<i64: 1, 5, 64>}]} {
    %c0 = arith.constant 0 : index
    %c0_0 = arith.constant 0 : index
    %c0_1 = arith.constant 0 : index
    %0 = vector.load %arg1[%c0, %c0_0, %c0_1] : memref<1x5x192xf32, #tpu.memory_space<vmem>>, vector<1x5x192xf32>
    %1 = vector.shape_cast %0 : vector<1x5x192xf32> to vector<5x192xf32>
    %2 = vector.extract_strided_slice %1 {offsets = [0, 0], sizes = [5, 32], strides = [1, 1]} : vector<5x192xf32> to vector<5x32xf32>
    %3 = arith.truncf %2 : vector<5x32xf32> to vector<5x32xbf16>
    %4 = vector.extract_strided_slice %1 {offsets = [0, 64], sizes = [5, 32], strides = [1, 1]} : vector<5x192xf32> to vector<5x32xf32>
    %5 = arith.truncf %4 : vector<5x32xf32> to vector<5x32xbf16>
    %6 = vector.extract_strided_slice %1 {offsets = [0, 128], sizes = [5, 32], strides = [1, 1]} : vector<5x192xf32> to vector<5x32xf32>
    %7 = arith.truncf %6 : vector<5x32xf32> to vector<5x32xbf16>
    %cst = arith.constant dense<0.000000e+00> : vector<5x5xf32>
    %8 = tpu.matmul %3, %5, %cst {dimension_numbers = #tpu.dot_dimension_numbers<[1], [1], [0], [0], [0, 0, 1, 0], [], []>} : vector<5x32xbf16>, vector<5x32xbf16>, vector<5x5xf32> -> vector<5x5xf32>
    %cst_2 = arith.constant 0.176776692 : f32
    %9 = vector.broadcast %cst_2 : f32 to vector<5x5xf32>
    %10 = arith.mulf %8, %9 : vector<5x5xf32>
    %cst_3 = arith.constant dense<0xFF800000> : vector<5xf32>
    %11 = vector.multi_reduction <maximumf>, %10, %cst_3 [1] : vector<5x5xf32> to vector<5xf32>
    %12 = vector.shape_cast %11 : vector<5xf32> to vector<5x1xf32>
    %13 = vector.broadcast %12 : vector<5x1xf32> to vector<5x5xf32>
    %14 = arith.subf %10, %13 : vector<5x5xf32>
    %15 = math.exp %14 : vector<5x5xf32>
    %cst_4 = arith.constant dense<0.000000e+00> : vector<5xf32>
    %16 = vector.multi_reduction <add>, %15, %cst_4 [1] : vector<5x5xf32> to vector<5xf32>
    %17 = vector.shape_cast %16 : vector<5xf32> to vector<5x1xf32>
    %18 = tpu.reciprocal %17 {approx = true} : vector<5x1xf32> -> vector<5x1xf32>
    %19 = vector.broadcast %18 : vector<5x1xf32> to vector<5x5xf32>
    %20 = arith.mulf %15, %19 : vector<5x5xf32>
    %21 = arith.truncf %20 : vector<5x5xf32> to vector<5x5xbf16>
    %cst_5 = arith.constant dense<0.000000e+00> : vector<5x32xf32>
    %22 = tpu.matmul %21, %7, %cst_5 {dimension_numbers = #tpu.dot_dimension_numbers<[1], [0], [0], [1], [0, 0, 1, 1], [], []>} : vector<5x5xbf16>, vector<5x32xbf16>, vector<5x32xf32> -> vector<5x32xf32>
    %23 = vector.extract_strided_slice %1 {offsets = [0, 32], sizes = [5, 32], strides = [1, 1]} : vector<5x192xf32> to vector<5x32xf32>
    %24 = arith.truncf %23 : vector<5x32xf32> to vector<5x32xbf16>
    %25 = vector.extract_strided_slice %1 {offsets = [0, 96], sizes = [5, 32], strides = [1, 1]} : vector<5x192xf32> to vector<5x32xf32>
    %26 = arith.truncf %25 : vector<5x32xf32> to vector<5x32xbf16>
    %27 = vector.extract_strided_slice %1 {offsets = [0, 160], sizes = [5, 32], strides = [1, 1]} : vector<5x192xf32> to vector<5x32xf32>
    %28 = arith.truncf %27 : vector<5x32xf32> to vector<5x32xbf16>
    %cst_6 = arith.constant dense<0.000000e+00> : vector<5x5xf32>
    %29 = tpu.matmul %24, %26, %cst_6 {dimension_numbers = #tpu.dot_dimension_numbers<[1], [1], [0], [0], [0, 0, 1, 0], [], []>} : vector<5x32xbf16>, vector<5x32xbf16>, vector<5x5xf32> -> vector<5x5xf32>
    %cst_7 = arith.constant 0.176776692 : f32
    %30 = vector.broadcast %cst_7 : f32 to vector<5x5xf32>
    %31 = arith.mulf %29, %30 : vector<5x5xf32>
    %cst_8 = arith.constant dense<0xFF800000> : vector<5xf32>
    %32 = vector.multi_reduction <maximumf>, %31, %cst_8 [1] : vector<5x5xf32> to vector<5xf32>
    %33 = vector.shape_cast %32 : vector<5xf32> to vector<5x1xf32>
    %34 = vector.broadcast %33 : vector<5x1xf32> to vector<5x5xf32>
    %35 = arith.subf %31, %34 : vector<5x5xf32>
    %36 = math.exp %35 : vector<5x5xf32>
    %cst_9 = arith.constant dense<0.000000e+00> : vector<5xf32>
    %37 = vector.multi_reduction <add>, %36, %cst_9 [1] : vector<5x5xf32> to vector<5xf32>
    %38 = vector.shape_cast %37 : vector<5xf32> to vector<5x1xf32>
    %39 = tpu.reciprocal %38 {approx = true} : vector<5x1xf32> -> vector<5x1xf32>
    %40 = vector.broadcast %39 : vector<5x1xf32> to vector<5x5xf32>
    %41 = arith.mulf %36, %40 : vector<5x5xf32>
    %42 = arith.truncf %41 : vector<5x5xf32> to vector<5x5xbf16>
    %cst_10 = arith.constant dense<0.000000e+00> : vector<5x32xf32>
    %43 = tpu.matmul %42, %28, %cst_10 {dimension_numbers = #tpu.dot_dimension_numbers<[1], [0], [0], [1], [0, 0, 1, 1], [], []>} : vector<5x5xbf16>, vector<5x32xbf16>, vector<5x32xf32> -> vector<5x32xf32>
    %44 = tpu.concatenate %22, %43 in 1 : vector<5x32xf32>, vector<5x32xf32> -> vector<5x64xf32>
    %45 = arith.truncf %44 : vector<5x64xf32> to vector<5x64xbf16>
    %c0_11 = arith.constant 0 : index
    %c0_12 = arith.constant 0 : index
    %46 = vector.load %arg3[%c0_11, %c0_12] : memref<64x64xbf16, #tpu.memory_space<vmem>>, vector<64x64xbf16>
    %cst_13 = arith.constant dense<0.000000e+00> : vector<5x64xf32>
    %47 = tpu.matmul %45, %46, %cst_13 {dimension_numbers = #tpu.dot_dimension_numbers<[1], [0], [0], [1], [0, 0, 1, 1], [], []>} : vector<5x64xbf16>, vector<64x64xbf16>, vector<5x64xf32> -> vector<5x64xf32>
    %c0_14 = arith.constant 0 : index
    %c0_15 = arith.constant 0 : index
    %48 = vector.load %arg4[%c0_14, %c0_15] : memref<1x64xf32, #tpu.memory_space<vmem>>, vector<1x64xf32>
    %49 = vector.broadcast %48 : vector<1x64xf32> to vector<5x64xf32>
    %50 = arith.addf %47, %49 : vector<5x64xf32>
    %c0_16 = arith.constant 0 : index
    %c0_17 = arith.constant 0 : index
    %c0_18 = arith.constant 0 : index
    %51 = vector.load %arg2[%c0_16, %c0_17, %c0_18] : memref<1x5x64xf32, #tpu.memory_space<vmem>>, vector<1x5x64xf32>
    %52 = vector.shape_cast %51 : vector<1x5x64xf32> to vector<5x64xf32>
    %c0_19 = arith.constant 0 : index
    %c0_20 = arith.constant 0 : index
    %53 = vector.load %arg5[%c0_19, %c0_20] : memref<1x64xf32, #tpu.memory_space<vmem>>, vector<1x64xf32>
    %54 = vector.broadcast %53 : vector<1x64xf32> to vector<5x64xf32>
    %55 = arith.mulf %50, %54 : vector<5x64xf32>
    %56 = arith.addf %52, %55 : vector<5x64xf32>
    %c0_21 = arith.constant 0 : index
    %c0_22 = arith.constant 0 : index
    %c0_23 = arith.constant 0 : index
    %57 = vector.load %arg6[%c0_21, %c0_22, %c0_23] : memref<1x5x64xf32, #tpu.memory_space<vmem>>, vector<1x5x64xf32>
    %58 = vector.shape_cast %57 : vector<1x5x64xf32> to vector<5x64xf32>
    %59 = vector.shape_cast %56 : vector<5x64xf32> to vector<1x5x64xf32>
    tpu.vector_store %arg6[%c0_21, %c0_22, %c0_23], %59 {strides = array<i32>} : memref<1x5x64xf32, #tpu.memory_space<vmem>>, vector<1x5x64xf32>,
    return
  }
  func.func @transform_0(%arg0: i32) -> (i32, i32, i32) {
    %c0_i32 = arith.constant 0 : i32
    %c0_i32_0 = arith.constant 0 : i32
    %c0_i32_1 = arith.constant 0 : i32
    return %arg0, %c0_i32, %c0_i32_0 : i32, i32, i32
  }
  func.func @transform_1(%arg0: i32) -> (i32, i32, i32) {
    %c0_i32 = arith.constant 0 : i32
    %c0_i32_0 = arith.constant 0 : i32
    %c0_i32_1 = arith.constant 0 : i32
    return %arg0, %c0_i32, %c0_i32_0 : i32, i32, i32
  }
  func.func @transform_2(%arg0: i32) -> (i32, i32) {
    %c0_i32 = arith.constant 0 : i32
    %c0_i32_0 = arith.constant 0 : i32
    %c0_i32_1 = arith.constant 0 : i32
    return %c0_i32, %c0_i32_0 : i32, i32
  }
  func.func @transform_3(%arg0: i32) -> (i32, i32) {
    %c0_i32 = arith.constant 0 : i32
    %c0_i32_0 = arith.constant 0 : i32
    %c0_i32_1 = arith.constant 0 : i32
    return %c0_i32, %c0_i32_0 : i32, i32
  }
  func.func @transform_4(%arg0: i32) -> (i32, i32) {
    %c0_i32 = arith.constant 0 : i32
    %c0_i32_0 = arith.constant 0 : i32
    %c0_i32_1 = arith.constant 0 : i32
    return %c0_i32, %c0_i32_0 : i32, i32
  }
  func.func @transform_5(%arg0: i32) -> (i32, i32, i32) {
    %c0_i32 = arith.constant 0 : i32
    %c0_i32_0 = arith.constant 0 : i32
    %c0_i32_1 = arith.constant 0 : i32
    return %arg0, %c0_i32, %c0_i32_0 : i32, i32, i32
  }
}

module attributes {stable_mosaic.version = 11 : i64} {
  func.func @_ln_mlp_res_kernel(%arg0: i32, %arg1: memref<16x64xf32, #tpu.memory_space<vmem>>, %arg2: memref<1x64xf32, #tpu.memory_space<vmem>>, %arg3: memref<1x64xf32, #tpu.memory_space<vmem>>, %arg4: memref<64x256xbf16, #tpu.memory_space<vmem>>, %arg5: memref<1x256xf32, #tpu.memory_space<vmem>>, %arg6: memref<256x64xbf16, #tpu.memory_space<vmem>>, %arg7: memref<1x64xf32, #tpu.memory_space<vmem>>, %arg8: memref<1x64xf32, #tpu.memory_space<vmem>>, %arg9: memref<16x64xf32, #tpu.memory_space<vmem>>) attributes {dimension_semantics = [#tpu.dimension_semantics<parallel>], iteration_bounds = array<i64: 1>, scalar_prefetch = 0 : i64, scratch_operands = 0 : i64, tpu.core_type = #tpu.core_type<tc>, window_params = [{transform_indices = @transform_0, window_bounds = array<i64: 16, 64>}, {pipeline_mode = #tpu.pipeline_mode<synchronous>, transform_indices = @transform_1, window_bounds = array<i64: 1, 64>}, {pipeline_mode = #tpu.pipeline_mode<synchronous>, transform_indices = @transform_2, window_bounds = array<i64: 1, 64>}, {pipeline_mode = #tpu.pipeline_mode<synchronous>, transform_indices = @transform_3, window_bounds = array<i64: 64, 256>}, {pipeline_mode = #tpu.pipeline_mode<synchronous>, transform_indices = @transform_4, window_bounds = array<i64: 1, 256>}, {pipeline_mode = #tpu.pipeline_mode<synchronous>, transform_indices = @transform_5, window_bounds = array<i64: 256, 64>}, {pipeline_mode = #tpu.pipeline_mode<synchronous>, transform_indices = @transform_6, window_bounds = array<i64: 1, 64>}, {pipeline_mode = #tpu.pipeline_mode<synchronous>, transform_indices = @transform_7, window_bounds = array<i64: 1, 64>}, {transform_indices = @transform_8, window_bounds = array<i64: 16, 64>}]} {
    %c0 = arith.constant 0 : index
    %c0_0 = arith.constant 0 : index
    %0 = vector.load %arg1[%c0, %c0_0] : memref<16x64xf32, #tpu.memory_space<vmem>>, vector<16x64xf32>
    %cst = arith.constant dense<0.000000e+00> : vector<16xf32>
    %1 = vector.multi_reduction <add>, %0, %cst [1] : vector<16x64xf32> to vector<16xf32>
    %2 = vector.shape_cast %1 : vector<16xf32> to vector<16x1xf32>
    %cst_1 = arith.constant 6.400000e+01 : f32
    %3 = vector.broadcast %cst_1 : f32 to vector<16x1xf32>
    %4 = arith.divf %2, %3 : vector<16x1xf32>
    %5 = vector.broadcast %4 : vector<16x1xf32> to vector<16x64xf32>
    %6 = arith.subf %0, %5 : vector<16x64xf32>
    %7 = arith.mulf %6, %6 : vector<16x64xf32>
    %cst_2 = arith.constant dense<0.000000e+00> : vector<16xf32>
    %8 = vector.multi_reduction <add>, %7, %cst_2 [1] : vector<16x64xf32> to vector<16xf32>
    %9 = vector.shape_cast %8 : vector<16xf32> to vector<16x1xf32>
    %cst_3 = arith.constant 6.400000e+01 : f32
    %10 = vector.broadcast %cst_3 : f32 to vector<16x1xf32>
    %11 = arith.divf %9, %10 : vector<16x1xf32>
    %12 = vector.broadcast %4 : vector<16x1xf32> to vector<16x64xf32>
    %13 = arith.subf %0, %12 : vector<16x64xf32>
    %cst_4 = arith.constant 9.99999997E-7 : f32
    %14 = vector.broadcast %cst_4 : f32 to vector<16x1xf32>
    %15 = arith.addf %11, %14 : vector<16x1xf32>
    %16 = math.rsqrt %15 : vector<16x1xf32>
    %17 = vector.broadcast %16 : vector<16x1xf32> to vector<16x64xf32>
    %18 = arith.mulf %13, %17 : vector<16x64xf32>
    %c0_5 = arith.constant 0 : index
    %c0_6 = arith.constant 0 : index
    %19 = vector.load %arg2[%c0_5, %c0_6] : memref<1x64xf32, #tpu.memory_space<vmem>>, vector<1x64xf32>
    %20 = vector.broadcast %19 : vector<1x64xf32> to vector<16x64xf32>
    %21 = arith.mulf %18, %20 : vector<16x64xf32>
    %c0_7 = arith.constant 0 : index
    %c0_8 = arith.constant 0 : index
    %22 = vector.load %arg3[%c0_7, %c0_8] : memref<1x64xf32, #tpu.memory_space<vmem>>, vector<1x64xf32>
    %23 = vector.broadcast %22 : vector<1x64xf32> to vector<16x64xf32>
    %24 = arith.addf %21, %23 : vector<16x64xf32>
    %25 = arith.truncf %24 : vector<16x64xf32> to vector<16x64xbf16>
    %c0_9 = arith.constant 0 : index
    %c0_10 = arith.constant 0 : index
    %26 = vector.load %arg4[%c0_9, %c0_10] : memref<64x256xbf16, #tpu.memory_space<vmem>>, vector<64x256xbf16>
    %cst_11 = arith.constant dense<0.000000e+00> : vector<16x256xf32>
    %27 = tpu.matmul %25, %26, %cst_11 {dimension_numbers = #tpu.dot_dimension_numbers<[1], [0], [0], [1], [0, 0, 1, 1], [], []>} : vector<16x64xbf16>, vector<64x256xbf16>, vector<16x256xf32> -> vector<16x256xf32>
    %c0_12 = arith.constant 0 : index
    %c0_13 = arith.constant 0 : index
    %28 = vector.load %arg5[%c0_12, %c0_13] : memref<1x256xf32, #tpu.memory_space<vmem>>, vector<1x256xf32>
    %29 = vector.broadcast %28 : vector<1x256xf32> to vector<16x256xf32>
    %30 = arith.addf %27, %29 : vector<16x256xf32>
    %31 = arith.mulf %30, %30 : vector<16x256xf32>
    %32 = arith.mulf %30, %31 : vector<16x256xf32>
    %cst_14 = arith.constant 4.471500e-02 : f32
    %33 = vector.broadcast %cst_14 : f32 to vector<16x256xf32>
    %34 = arith.mulf %33, %32 : vector<16x256xf32>
    %35 = arith.addf %30, %34 : vector<16x256xf32>
    %cst_15 = arith.constant 0.797884583 : f32
    %36 = vector.broadcast %cst_15 : f32 to vector<16x256xf32>
    %37 = arith.mulf %36, %35 : vector<16x256xf32>
    %38 = math.tanh %37 : vector<16x256xf32>
    %cst_16 = arith.constant 1.000000e+00 : f32
    %39 = vector.broadcast %cst_16 : f32 to vector<16x256xf32>
    %40 = arith.addf %39, %38 : vector<16x256xf32>
    %cst_17 = arith.constant 5.000000e-01 : f32
    %41 = vector.broadcast %cst_17 : f32 to vector<16x256xf32>
    %42 = arith.mulf %41, %40 : vector<16x256xf32>
    %43 = arith.mulf %30, %42 : vector<16x256xf32>
    %44 = arith.truncf %43 : vector<16x256xf32> to vector<16x256xbf16>
    %c0_18 = arith.constant 0 : index
    %c0_19 = arith.constant 0 : index
    %45 = vector.load %arg6[%c0_18, %c0_19] : memref<256x64xbf16, #tpu.memory_space<vmem>>, vector<256x64xbf16>
    %cst_20 = arith.constant dense<0.000000e+00> : vector<16x64xf32>
    %46 = tpu.matmul %44, %45, %cst_20 {dimension_numbers = #tpu.dot_dimension_numbers<[1], [0], [0], [1], [0, 0, 1, 1], [], []>} : vector<16x256xbf16>, vector<256x64xbf16>, vector<16x64xf32> -> vector<16x64xf32>
    %c0_21 = arith.constant 0 : index
    %c0_22 = arith.constant 0 : index
    %47 = vector.load %arg7[%c0_21, %c0_22] : memref<1x64xf32, #tpu.memory_space<vmem>>, vector<1x64xf32>
    %48 = vector.broadcast %47 : vector<1x64xf32> to vector<16x64xf32>
    %49 = arith.addf %46, %48 : vector<16x64xf32>
    %c0_23 = arith.constant 0 : index
    %c0_24 = arith.constant 0 : index
    %50 = vector.load %arg8[%c0_23, %c0_24] : memref<1x64xf32, #tpu.memory_space<vmem>>, vector<1x64xf32>
    %51 = vector.broadcast %50 : vector<1x64xf32> to vector<16x64xf32>
    %52 = arith.mulf %49, %51 : vector<16x64xf32>
    %53 = arith.addf %0, %52 : vector<16x64xf32>
    %c0_25 = arith.constant 0 : index
    %c0_26 = arith.constant 0 : index
    %54 = vector.load %arg9[%c0_25, %c0_26] : memref<16x64xf32, #tpu.memory_space<vmem>>, vector<16x64xf32>
    tpu.vector_store %arg9[%c0_25, %c0_26], %53 {strides = array<i32>} : memref<16x64xf32, #tpu.memory_space<vmem>>, vector<16x64xf32>,
    return
  }
  func.func @transform_0(%arg0: i32) -> (i32, i32) {
    %c0_i32 = arith.constant 0 : i32
    %c0_i32_0 = arith.constant 0 : i32
    return %arg0, %c0_i32 : i32, i32
  }
  func.func @transform_1(%arg0: i32) -> (i32, i32) {
    %c0_i32 = arith.constant 0 : i32
    %c0_i32_0 = arith.constant 0 : i32
    %c0_i32_1 = arith.constant 0 : i32
    return %c0_i32, %c0_i32_0 : i32, i32
  }
  func.func @transform_2(%arg0: i32) -> (i32, i32) {
    %c0_i32 = arith.constant 0 : i32
    %c0_i32_0 = arith.constant 0 : i32
    %c0_i32_1 = arith.constant 0 : i32
    return %c0_i32, %c0_i32_0 : i32, i32
  }
  func.func @transform_3(%arg0: i32) -> (i32, i32) {
    %c0_i32 = arith.constant 0 : i32
    %c0_i32_0 = arith.constant 0 : i32
    %c0_i32_1 = arith.constant 0 : i32
    return %c0_i32, %c0_i32_0 : i32, i32
  }
  func.func @transform_4(%arg0: i32) -> (i32, i32) {
    %c0_i32 = arith.constant 0 : i32
    %c0_i32_0 = arith.constant 0 : i32
    %c0_i32_1 = arith.constant 0 : i32
    return %c0_i32, %c0_i32_0 : i32, i32
  }
  func.func @transform_5(%arg0: i32) -> (i32, i32) {
    %c0_i32 = arith.constant 0 : i32
    %c0_i32_0 = arith.constant 0 : i32
    %c0_i32_1 = arith.constant 0 : i32
    return %c0_i32, %c0_i32_0 : i32, i32
  }
  func.func @transform_6(%arg0: i32) -> (i32, i32) {
    %c0_i32 = arith.constant 0 : i32
    %c0_i32_0 = arith.constant 0 : i32
    %c0_i32_1 = arith.constant 0 : i32
    return %c0_i32, %c0_i32_0 : i32, i32
  }
  func.func @transform_7(%arg0: i32) -> (i32, i32) {
    %c0_i32 = arith.constant 0 : i32
    %c0_i32_0 = arith.constant 0 : i32
    %c0_i32_1 = arith.constant 0 : i32
    return %c0_i32, %c0_i32_0 : i32, i32
  }
  func.func @transform_8(%arg0: i32) -> (i32, i32) {
    %c0_i32 = arith.constant 0 : i32
    %c0_i32_0 = arith.constant 0 : i32
    return %arg0, %c0_i32 : i32, i32
  }
}

module attributes {stable_mosaic.version = 11 : i64} {
  func.func @_ln_matmul_kernel(%arg0: i32, %arg1: memref<16x64xf32, #tpu.memory_space<vmem>>, %arg2: memref<1x64xf32, #tpu.memory_space<vmem>>, %arg3: memref<1x64xf32, #tpu.memory_space<vmem>>, %arg4: memref<64x64xbf16, #tpu.memory_space<vmem>>, %arg5: memref<1x64xf32, #tpu.memory_space<vmem>>, %arg6: memref<16x64xf32, #tpu.memory_space<vmem>>) attributes {dimension_semantics = [#tpu.dimension_semantics<parallel>], iteration_bounds = array<i64: 1>, scalar_prefetch = 0 : i64, scratch_operands = 0 : i64, tpu.core_type = #tpu.core_type<tc>, window_params = [{transform_indices = @transform_0, window_bounds = array<i64: 16, 64>}, {pipeline_mode = #tpu.pipeline_mode<synchronous>, transform_indices = @transform_1, window_bounds = array<i64: 1, 64>}, {pipeline_mode = #tpu.pipeline_mode<synchronous>, transform_indices = @transform_2, window_bounds = array<i64: 1, 64>}, {pipeline_mode = #tpu.pipeline_mode<synchronous>, transform_indices = @transform_3, window_bounds = array<i64: 64, 64>}, {pipeline_mode = #tpu.pipeline_mode<synchronous>, transform_indices = @transform_4, window_bounds = array<i64: 1, 64>}, {transform_indices = @transform_5, window_bounds = array<i64: 16, 64>}]} {
    %c0 = arith.constant 0 : index
    %c0_0 = arith.constant 0 : index
    %0 = vector.load %arg1[%c0, %c0_0] : memref<16x64xf32, #tpu.memory_space<vmem>>, vector<16x64xf32>
    %cst = arith.constant dense<0.000000e+00> : vector<16xf32>
    %1 = vector.multi_reduction <add>, %0, %cst [1] : vector<16x64xf32> to vector<16xf32>
    %2 = vector.shape_cast %1 : vector<16xf32> to vector<16x1xf32>
    %cst_1 = arith.constant 6.400000e+01 : f32
    %3 = vector.broadcast %cst_1 : f32 to vector<16x1xf32>
    %4 = arith.divf %2, %3 : vector<16x1xf32>
    %5 = vector.broadcast %4 : vector<16x1xf32> to vector<16x64xf32>
    %6 = arith.subf %0, %5 : vector<16x64xf32>
    %7 = arith.mulf %6, %6 : vector<16x64xf32>
    %cst_2 = arith.constant dense<0.000000e+00> : vector<16xf32>
    %8 = vector.multi_reduction <add>, %7, %cst_2 [1] : vector<16x64xf32> to vector<16xf32>
    %9 = vector.shape_cast %8 : vector<16xf32> to vector<16x1xf32>
    %cst_3 = arith.constant 6.400000e+01 : f32
    %10 = vector.broadcast %cst_3 : f32 to vector<16x1xf32>
    %11 = arith.divf %9, %10 : vector<16x1xf32>
    %12 = vector.broadcast %4 : vector<16x1xf32> to vector<16x64xf32>
    %13 = arith.subf %0, %12 : vector<16x64xf32>
    %cst_4 = arith.constant 9.99999997E-7 : f32
    %14 = vector.broadcast %cst_4 : f32 to vector<16x1xf32>
    %15 = arith.addf %11, %14 : vector<16x1xf32>
    %16 = math.rsqrt %15 : vector<16x1xf32>
    %17 = vector.broadcast %16 : vector<16x1xf32> to vector<16x64xf32>
    %18 = arith.mulf %13, %17 : vector<16x64xf32>
    %c0_5 = arith.constant 0 : index
    %c0_6 = arith.constant 0 : index
    %19 = vector.load %arg2[%c0_5, %c0_6] : memref<1x64xf32, #tpu.memory_space<vmem>>, vector<1x64xf32>
    %20 = vector.broadcast %19 : vector<1x64xf32> to vector<16x64xf32>
    %21 = arith.mulf %18, %20 : vector<16x64xf32>
    %c0_7 = arith.constant 0 : index
    %c0_8 = arith.constant 0 : index
    %22 = vector.load %arg3[%c0_7, %c0_8] : memref<1x64xf32, #tpu.memory_space<vmem>>, vector<1x64xf32>
    %23 = vector.broadcast %22 : vector<1x64xf32> to vector<16x64xf32>
    %24 = arith.addf %21, %23 : vector<16x64xf32>
    %25 = arith.truncf %24 : vector<16x64xf32> to vector<16x64xbf16>
    %c0_9 = arith.constant 0 : index
    %c0_10 = arith.constant 0 : index
    %26 = vector.load %arg4[%c0_9, %c0_10] : memref<64x64xbf16, #tpu.memory_space<vmem>>, vector<64x64xbf16>
    %cst_11 = arith.constant dense<0.000000e+00> : vector<16x64xf32>
    %27 = tpu.matmul %25, %26, %cst_11 {dimension_numbers = #tpu.dot_dimension_numbers<[1], [0], [0], [1], [0, 0, 1, 1], [], []>} : vector<16x64xbf16>, vector<64x64xbf16>, vector<16x64xf32> -> vector<16x64xf32>
    %c0_12 = arith.constant 0 : index
    %c0_13 = arith.constant 0 : index
    %28 = vector.load %arg5[%c0_12, %c0_13] : memref<1x64xf32, #tpu.memory_space<vmem>>, vector<1x64xf32>
    %29 = vector.broadcast %28 : vector<1x64xf32> to vector<16x64xf32>
    %30 = arith.addf %27, %29 : vector<16x64xf32>
    %c0_14 = arith.constant 0 : index
    %c0_15 = arith.constant 0 : index
    %31 = vector.load %arg6[%c0_14, %c0_15] : memref<16x64xf32, #tpu.memory_space<vmem>>, vector<16x64xf32>
    tpu.vector_store %arg6[%c0_14, %c0_15], %30 {strides = array<i32>} : memref<16x64xf32, #tpu.memory_space<vmem>>, vector<16x64xf32>,
    return
  }
  func.func @transform_0(%arg0: i32) -> (i32, i32) {
    %c0_i32 = arith.constant 0 : i32
    %c0_i32_0 = arith.constant 0 : i32
    return %arg0, %c0_i32 : i32, i32
  }
  func.func @transform_1(%arg0: i32) -> (i32, i32) {
    %c0_i32 = arith.constant 0 : i32
    %c0_i32_0 = arith.constant 0 : i32
    %c0_i32_1 = arith.constant 0 : i32
    return %c0_i32, %c0_i32_0 : i32, i32
  }
  func.func @transform_2(%arg0: i32) -> (i32, i32) {
    %c0_i32 = arith.constant 0 : i32
    %c0_i32_0 = arith.constant 0 : i32
    %c0_i32_1 = arith.constant 0 : i32
    return %c0_i32, %c0_i32_0 : i32, i32
  }
  func.func @transform_3(%arg0: i32) -> (i32, i32) {
    %c0_i32 = arith.constant 0 : i32
    %c0_i32_0 = arith.constant 0 : i32
    %c0_i32_1 = arith.constant 0 : i32
    return %c0_i32, %c0_i32_0 : i32, i32
  }
  func.func @transform_4(%arg0: i32) -> (i32, i32) {
    %c0_i32 = arith.constant 0 : i32
    %c0_i32_0 = arith.constant 0 : i32
    %c0_i32_1 = arith.constant 0 : i32
    return %c0_i32, %c0_i32_0 : i32, i32
  }
  func.func @transform_5(%arg0: i32) -> (i32, i32) {
    %c0_i32 = arith.constant 0 : i32
    %c0_i32_0 = arith.constant 0 : i32
    return %arg0, %c0_i32 : i32, i32
  }
}

</mosaic_0001>

<bundles_post_ra>
// kernel: frozen_dinov2_encoder.9
= control target key start
LH: loop header
LB: loop body
LE: loop exit
PB: predicated region body
PF: predicated region fallthrough
CT: control target
= control target key end

     0   :  { %s814_s0 = inlined_call_operand.hbm [shape: f32[2,3,16,16], index: 0, kind: input, shape index: {}]   ;;  %s815_s1 = inlined_call_operand.vmem [shape: f32[3], index: 1, kind: input, shape index: {}]   ;;  %s816_s2 = inlined_call_operand.vmem [shape: f32[3], index: 2, kind: input, shape index: {}]   ;;  %s817_s3 = inlined_call_operand.vmem [shape: f32[2,3,16,16], index: 3, kind: output, shape index: {}]  }
   0x1   :  { %825 = sst [smem:[#allocation13_spill]] %s815_s1 }
   0x2   :  { %826 = sst [smem:[#allocation14_spill]] %s816_s2 }
   0x3   :  { %8 = vsyncpa [#allocation3], 0 }
   0x4   :  { %10 = vsyncpa [#allocation3 + $0x1], 0 }
   0x5   :  { %11 = vsyncpa [#allocation4], 0 }
   0x6   :  { %12 = vsyncpa [#allocation7], 0  ;;  %s655_s12 = smov 0   ;;  %s657_s13 = smov 0  }
   0x7   :  { %s659_s14 = smov 0   ;;  %s661_s15 = smov 0  }
   0x8   :  { %s663_s16 = smov 0   ;;  %s665_s17 = smov 0  }
   0x9   :  { %s667_s18 = smov 0   ;;  %s669_s19 = smov 0  }
   0xa LB: > { %827 = sst [smem:[#allocation11_spill]] %s620_s17  ;;  %s381_s20 = sadd.s32 4294967295, %s628_s19   ;;  %s628_s19 = sphi %s669_s19, %s18_s19   ;;  %s624_s18 = sphi %s667_s18, %s847_s18   ;;  %s620_s17 = sphi %s665_s17, %s842_s17   ;;  %s616_s16 = sphi %s663_s16, %s846_s16   ;;  %s612_s15 = sphi %s661_s15, %s841_s15   ;;  %s608_s14 = sphi %s659_s14, %s845_s14   ;;  %s604_s13 = sphi %s657_s13, %s844_s13   ;;  %s600_s12 = sphi %s655_s12, %s843_s12  }
   0xb   : > { %p46_p0 = scmp.ne.s32.totalorder %s608_s14, %s604_s13  ;;  %p47_p1 = scmp.eq.s32.totalorder %s628_s19, 0 }
   0xc   : > { %p52_p2 = scmp.ne.s32.totalorder %s604_s13, %s600_s12  ;;  %p699_p3 = scmp.eq.s32.totalorder %s381_s20, 0 }
   0xd   : > { %p48_p4 = por %p47_p1, %p46_p0  ;;  %p383_p5 = scmp.ge.s32.totalorder %s628_s19, 1 }
   0xe   : > { %s828_s22 = scalar_select %p699_p3, 1, 0 }
   0xf   : > { %p706_p6 = por %p699_p3, %p52_p2  ;;  %p133_p7 = scmp.lt.s32.totalorder %s628_s19, 7 }
  0x10   : > { %s830_s1 = sld [smem:[#allocation13_spill]]  ;;  %p423_p10 = scmp.lt.s32.totalorder %s628_s19, 6 }
  0x11   : > { %s829_s23 = scalar_select %p706_p6, 1, 0 }
  0x12   : > { %p714_p8 = pnand %p383_p5, %p133_p7  ;;  %s832_s2 = sld [smem:[#allocation14_spill]] }
  0x13   : > { %p730_p12 = pnand %p423_p10, %p48_p4 }
  0x14   : > { %s831_s27 = scalar_select %p714_p8, 1, 0 }
  0x15   : > { %p410_p9 = pneg %p714_p8 }
  0x16   : > { %s146_s26 = sshll.u32 %s830_s1, 4  ;;  %s147_s26 = int_to_ptr.vmem [resolvable:$true] %s146_s26 }
  0x17   : > { %p726_p11 = pnand %p410_p9, %p699_p3  ;;  %s496_s6 = scalar_lea.vmem %s147_s26, 16 }
  0x18   : > { %s157_s30 = sshll.u32 %s832_s2, 4  ;;  %p497_p13 = scmp.ne.s32.totalorder %s147_s26, %s496_s6  ;;  %s158_s30 = int_to_ptr.vmem [resolvable:$true] %s157_s30 }
  0x19   : > { %s834_s5 = scalar_select %p730_p12, 1, 0 }
  0x1a   : > { %p498_p0 = pneg %p726_p11  ;;  %p504_p5 = scmp.lt.s32.totalorder %s147_s26, %s147_s26 }
  0x1b   : > { %p505_p7 = scmp.lt.s32.totalorder %s496_s6, %s496_s6 }
  0x1c   : > { %p499_p1 = pnand %p498_p0, %p497_p13 }
  0x1d   : > { %p506_p6 = por %p505_p7, %p504_p5 }
  0x1e   : > { %p500_p2 = pneg %p499_p1 }
  0x20   : > { %p507_p8 = pnand %p506_p6, %p500_p2 }
  0x22   : > { %510 = shalt.err (!%p507_p8)
}
  0x23   : > { %s630_s7 = smov [#allocation5]   ;;  %s511_s8 = scalar_lea.vmem %s158_s30, 16 }
  0x24   : > { %413 = dma.vmem_to_smem (!%p726_p11), %s147_s26, 16, %s630_s7, [#allocation4]  }
  0x25   : > { %p512_p4 = scmp.ne.s32.totalorder %s158_s30, %s511_s8  ;;  %p519_p3 = scmp.lt.s32.totalorder %s158_s30, %s158_s30 }
  0x26   : > { %p520_p12 = scmp.lt.s32.totalorder %s511_s8, %s511_s8 }
  0x27   : > { %p514_p9 = pnand %p512_p4, %p498_p0 }
  0x28   : > { %p521_p13 = por %p520_p12, %p519_p3 }
  0x29   : > { %p515_p10 = pneg %p514_p9 }
  0x2b   : > { %p522_p1 = pnand %p521_p13, %p515_p10 }
  0x2d   : > { %525 = shalt.err (!%p522_p1)
}
  0x2e   : > { %s631_s9 = smov [#allocation6]   ;;  %s27_s10 = sadd.s32 1, %s620_s17 }
  0x2f   : > { %416 = dma.vmem_to_smem (!%p726_p11), %s158_s30, 16, %s631_s9, [#allocation7]  }
  0x30   : > { %p28_p6 = scmp.ge.s32.totalorder %s27_s10, 3  ;;  %s30_s11 = sadd.s32 1, %s624_s18 }
  0x31   : > { %s168_s12 = sand.u32 1, %s608_s14   ;;  %s388_s20 = sshll.u32 %s620_s17, 1 }
  0x32   : > { %s849_s10 = smov (%p28_p6, %s27_s10), 0  ;;  %s851_s11 = smov (!%p28_p6, %s30_s11), %s624_s18 }
  0x33   : > { %835 = sst [smem:[#allocation12_spill]] %s849_s10  ;;  %s35_s24 = ssub.s32 %s620_s17, %s849_s10 }
  0x34   : > { %p32_p3 = scmp.ge.s32.totalorder %s851_s11, 2  ;;  %s387_s25 = sshll.u32 %s168_s12, 4 }
  0x35   : > { %s398_s26 = smul.u32 6, %s624_s18  ;;  %s172_s29 = scalar_lea.vmem [#allocation2], %s387_s25 }
  0x36   : > { %s853_s11 = smov (%p32_p3, %s851_s11), 0  ;;  %s181_s30 = sshll.u32 %s172_s29, 4  ;;  %s182_s30 = int_to_ptr.vmem [resolvable:$true] %s181_s30 }
  0x37   : > { %s178_s28 = sadd.s32 %s398_s26, %s388_s20  ;;  %s34_s4 = ssub.s32 %s624_s18, %s853_s11 }
  0x38   : > { %s389_s6 = sshll.u32 %s178_s28, 7  ;;  %s36_s7 = sor.u32 %s35_s24, %s34_s4 }
  0x39   : > { %s180_s21 = scalar_lea.hbm %s814_s0, %s389_s6  ;;  %p37_p8 = scmp.eq.s32.totalorder %s36_s7, 0 }
  0x3a   : > { %s836_s1 = sadd.s32 1, %s608_s14  ;;  %s169_s10 = scalar_lea.sflag [#allocation3], %s168_s12 }
  0x3b   : > { %s760_s2 = scalar_select %p37_p8, %s608_s14, %s836_s1  }
  0x3c   : > { %p837_p11 = scmp.ne.s32.totalorder %s834_s5, 0  ;;  %s539_s17 = scalar_lea.vmem %s182_s30, 256 }
  0x3d   : > { %p540_p0 = scmp.ne.s32.totalorder %s182_s30, %s539_s17  ;;  %s632_s20 = smov [#allocation2]  }
  0x3e   : > { %p528_p12 = pneg %p837_p11  ;;  %s544_s25 = sshll.u32 %s632_s20, 4  ;;  %s545_s25 = int_to_ptr.vmem [resolvable:$false] %s544_s25 }
  0x3f   : > { %s546_s24 = scalar_lea.vmem %s545_s25, 512  ;;  %p547_p7 = scmp.lt.s32.totalorder %s182_s30, %s545_s25 }
  0x40   : > { %p542_p2 = pnand %p540_p0, %p528_p12  ;;  %p548_p4 = scmp.lt.s32.totalorder %s546_s24, %s539_s17 }
  0x42   : > { %p543_p5 = pneg %p542_p2  ;;  %p549_p9 = por %p548_p4, %p547_p7 }
  0x44   : > { %p550_p10 = pnand %p549_p9, %p543_p5 }
  0x46   : > { %553 = shalt.err (!%p550_p10)
}
  0x47   : > { %s633_s26 = smov 128   ;;  %s634_s1 = smov 8  }
  0x48   : > { %420 = dma.hbm_to_vmem [thread:$0]  (!%p837_p11), %s180_s21, 256, %s182_s30, %s169_s10, %s633_s26, %s633_s26, %s634_s1  }
  0x49   : > { %p838_p13 = scmp.ne.s32.totalorder %s831_s27, 0 }
  0x4a   : > { %s195_s12 = sand.u32 (!%p838_p13), 1, %s604_s13   ;;  %p839_p1 = scmp.ne.s32.totalorder (!%p838_p13), %s829_s23, 0 }
  0x4b   : > { %193 = sbr.rel (%p838_p13) target bundleno = 112 (0x70), region = 32  ;;  %s391_s28 = sshll.u32 (!%p838_p13), %s195_s12, 4 }
  0x4c   : > { %s196_s29 = scalar_lea.sflag (!%p838_p13), [#allocation3], %s195_s12  ;;  %s199_s4 = scalar_lea.vmem (!%p838_p13), [#allocation2], %s391_s28 }
  0x50   : > { %587 = dma.done.wait (%p839_p1), %s196_s29, 256  }
  0x51   : > { %589 = vsyncadd (%p839_p1), %s196_s29, 4294967040  ;;  %p840_p6 = scmp.ne.s32.totalorder %s828_s22, 0 }
  0x53   : > { %591 = dma.done.wait (%p840_p6), [#allocation4], 16  }
  0x54   : > { %593 = vsyncadd (%p840_p6), [#allocation4], 4294967280 }
  0x55   : > { %595 = dma.done.wait (%p840_p6), [#allocation7], 16  }
  0x56   : > { %597 = vsyncadd (%p840_p6), [#allocation7], 4294967280 }
  0x57   : > { %212 = sfence }
  0x58   : > { %s250_s17 = sld [smem:[#allocation6 + %s612_s15]]  ;;  %p235_p3 = scmp.lt.s32.totalorder %s616_s16, 1  ;;  %v244_v1 = vld [vmem:[%s199_s4] sm:$0xff]  ;;  %v245_v3 = vld [vmem:[%s199_s4 + $0x8] sm:$0xff]  ;;  %vm255_vm0 = vcmask 130048  }
  0x59   : > { %p237_p8 = scmp.lt.s32.totalorder %s612_s15, 2  ;;  %s246_s21 = sld [smem:[#allocation5 + %s612_s15]] }
  0x5a   : > { %s855_s16 = smov (!%p235_p3, %s616_s16), 1 }
  0x5b   : > { %s857_s15 = smov (!%p237_p8, %s612_s15), 2  ;;  %s399_s23 = smul.u32 6, %s855_s16 }
  0x5c   : > { %s394_s27 = sshll.u32 %s857_s15, 1 }
  0x5d   : > { %s241_s5 = sadd.s32 %s399_s23, %s394_s27 }
  0x5e   : > { %v251_v0 = vstv %s250_s17  ;;  %s395_s22 = sshll.u32 %s241_s5, 3 }
  0x5f   : > { %494 = vrcp.f32 %v251_v0  ;;  %v247_v2 = vstv %s246_s21  ;;  %s243_s6 = scalar_lea.vmem %s817_s3, %s395_s22 }
  0x60   : > { %v248_v4 = vsub.f32 %v244_v1, %v247_v2  ;;  %v249_v5 = vsub.f32 %v245_v3, %v247_v2 }
  0x6c   : > { %v495_v6 = vpop.eup %494 }
  0x6d   : > { %v253_v7 = vmul.f32 %v495_v6, %v248_v4  ;;  %v254_v8 = vmul.f32 %v495_v6, %v249_v5 }
  0x6f   : > { %256 = vst.msk [vmem:[%s243_s6] sm:$0xff] %vm255_vm0, %v253_v7  ;;  %257 = vst.msk [vmem:[%s243_s6 + $0x8] sm:$0xff] %vm255_vm0, %v254_v8 }
  0x70 PF: > { %s18_s19 = sadd.s32 1, %s628_s19   ;;  %s841_s15 = sld [smem:[#allocation11_spill]] }
  0x71   : > { %p15_p11 = scmp.ge.s32.totalorder %s18_s19, 8   ;;  %s842_s17 = sld [smem:[#allocation12_spill]] }
  0x72   : > { %s843_s12 = smov %s604_s13  ;;  %s844_s13 = smov %s608_s14 }
  0x73   : > { %s845_s14 = smov %s760_s2  ;;  %s846_s16 = smov %s624_s18 }
  0x74   : > { %s847_s18 = smov %s853_s11  ;;  %17 = sbr.rel (!%p15_p11) target bundleno = 10 (0xa), region = 81 }
  0x79   :  { %287 = vsyncpa [#allocation3], 1 }
  0x7a   :  { %289 = vsyncpa [#allocation3 + $0x1], 1 }
  0x7b   :  { %290 = vsyncpa [#allocation4], 1 }
  0x7c   :  { %292 = vsyncpa [#allocation4 + $0x1], 1 }
  0x7d   :  { %293 = vsyncpa [#allocation7], 1 }

// kernel: frozen_dinov2_encoder.10
= control target key start
LH: loop header
LB: loop body
LE: loop exit
PB: predicated region body
PF: predicated region fallthrough
CT: control target
= control target key end

     0   :  { %v198_v0 = vmov 0   ;;  %vm122_vm0 = vcmask 523264   ;;  %s269_s1 = inlined_call_operand.vmem [shape: bf16[192,64], index: 1, kind: input, shape index: {}]   ;;  %s270_s0 = inlined_call_operand.vmem [shape: f32[8,192], index: 0, kind: input, shape index: {}]   ;;  %s271_s2 = inlined_call_operand.vmem [shape: f32[1,64], index: 2, kind: input, shape index: {}]   ;;  %s272_s3 = inlined_call_operand.vmem [shape: f32[8,64], index: 3, kind: output, shape index: {}]  }
   0x1   :  { %126 = vmatprep.subr.bf16.mxu0 %v198_v0  ;;  %v186_v1 = vld [vmem:[%s269_s1 + $0x38] sm:$0xff]   ;;  %v187_v2 = vld [vmem:[%s269_s1 + $0x30] sm:$0xff]   ;;  %v188_v3 = vld [vmem:[%s269_s1 + $0x28] sm:$0xff]  }
   0x2   :  { %127 = vmatpush1.bf16.msra.mxu0 %v186_v1  ;;  %v189_v4 = vld [vmem:[%s269_s1 + $0x20] sm:$0xff]   ;;  %v16_v5 = vld [vmem:[%s270_s0 + $0x8] sm:$0xff]  ;;  %v190_v7 = vld [vmem:[%s269_s1 + $0x18] sm:$0xff]  }
   0x3   :  { %128 = vmatprep.subr.bf16.mxu0 %v198_v0  ;;  %v18_v6 = vpack.c.bf16 %v16_v5, %v16_v5  ;;  %v191_v8 = vld [vmem:[%s269_s1 + $0x10] sm:$0xff]   ;;  %v192_v9 = vld [vmem:[%s269_s1 + $0x8] sm:$0xff]   ;;  %v193_v10 = vld [vmem:[%s269_s1] sm:$0xff]  }
   0x4   :  { %v194_v11 = vld [vmem:[%s269_s1 + $0x58] sm:$0xff]   ;;  %v195_v12 = vld [vmem:[%s269_s1 + $0x50] sm:$0xff]   ;;  %v196_v13 = vld [vmem:[%s269_s1 + $0x48] sm:$0xff]  }
   0x5   :  { %184 = vmatprep.mubr.msk.bf16.mxu0 %vm122_vm0, %v18_v6  ;;  %v197_v14 = vld [vmem:[%s269_s1 + $0x40] sm:$0xff]  }
   0x6   :  { %129 = vmatpush1.bf16.msra.mxu0 %v187_v2  ;;  %v15_v15 = vld [vmem:[%s270_s0] sm:$0xff] }
   0x7   :  { %130 = vmatprep.subr.bf16.mxu0 %v198_v0  ;;  %v17_v16 = vpack.c.bf16 %v15_v15, %v15_v15  ;;  %v171_v17 = vld [vmem:[%s271_s2] ss:$0 sm:$0xff] }
   0xa   :  { %131 = vmatpush1.bf16.msra.mxu0 %v188_v3 }
   0xb   :  { %132 = vmatprep.subr.bf16.mxu0 %v198_v0 }
   0xe   :  { %133 = vmatpush1.bf16.msra.mxu0 %v189_v4 }
   0xf   :  { %134 = vmatprep.subr.bf16.mxu0 %v198_v0 }
  0x12   :  { %135 = vmatpush1.bf16.msra.mxu0 %v190_v7 }
  0x13   :  { %136 = vmatprep.subr.bf16.mxu0 %v198_v0 }
  0x16   :  { %137 = vmatpush1.bf16.msra.mxu0 %v191_v8 }
  0x17   :  { %138 = vmatprep.subr.bf16.mxu0 %v198_v0 }
  0x1a   :  { %139 = vmatpush1.bf16.msra.mxu0 %v192_v9 }
  0x1b   :  { %140 = vmatprep.subr.bf16.mxu0 %v198_v0 }
  0x1e   :  { %141 = vmatpush1.bf16.msra.mxu0 %v193_v10 }
  0x1f   :  { %150 = vmatprep.subr.bf16.mxu0 %v198_v0 }
  0x22   :  { %151 = vmatpush2.bf16.msra.mxu0 %v194_v11 }
  0x23   :  { %152 = vmatprep.subr.bf16.mxu0 %v198_v0 }
  0x26   :  { %153 = vmatpush2.bf16.msra.mxu0 %v195_v12 }
  0x27   :  { %154 = vmatprep.subr.bf16.mxu0 %v198_v0 }
  0x2a   :  { %155 = vmatpush2.bf16.msra.mxu0 %v196_v13 }
  0x2b   :  { %156 = vmatprep.subr.bf16.mxu0 %v198_v0 }
  0x2e   :  { %157 = vmatpush2.bf16.msra.mxu0 %v197_v14 }
  0x31   :  { %159 = vmatmul.mubr.bf16.vlgmr.msra.gmra.mxu0 %v17_v16 }
  0xf1   :  { %v160_v18 = vpop.f32.mrf.mxu0 }
  0xf2   :  { %v161_v19 = vadd.f32 %v171_v17, %v160_v18 }
  0xf3   :  { %v162_v20 = vpop.f32.mrf.mxu0 }
  0xf4   :  { %166 = vst.msk [vmem:[%s272_s3] sm:$0xff] %vm122_vm0, %v161_v19 }
  0xf5   :  { %v163_v21 = vpop.f32.mrf.mxu0 }
  0xf7   :  { %v164_v22 = vpop.f32.mrf.mxu0 }

// kernel: frozen_dinov2_encoder.11
= control target key start
LH: loop header
LB: loop body
LE: loop exit
PB: predicated region body
PF: predicated region fallthrough
CT: control target
= control target key end

     0   :  { %vm23_vm0 = vcmask 523264   ;;  %v212_v15 = vmov 0   ;;  %v80_v40 = vlaneseq  ;;  %s301_s0 = inlined_call_operand.vmem [shape: f32[16,64], index: 0, kind: input, shape index: {}]   ;;  %s302_s3 = inlined_call_operand.vmem [shape: bf16[64,192], index: 3, kind: input, shape index: {}]   ;;  %s303_s1 = inlined_call_operand.vmem [shape: f32[1,64], index: 1, kind: input, shape index: {}]   ;;  %s304_s2 = inlined_call_operand.vmem [shape: f32[1,64], index: 2, kind: input, shape index: {}]   ;;  %s305_s4 = inlined_call_operand.vmem [shape: f32[1,192], index: 4, kind: input, shape index: {}]   ;;  %s306_s5 = inlined_call_operand.vmem [shape: f32[16,192], index: 5, kind: output, shape index: {}]  }
   0x1   :  { %v21_v0 = vld [vmem:[%s301_s0] sm:$0xff]  ;;  %v22_v1 = vld [vmem:[%s301_s0 + $0x8] sm:$0xff]  ;;  %v196_v14 = vld [vmem:[%s302_s3 + $0x34] ss:$8 sps:$4 sm:$0xff]   ;;  %165 = vmatprep.mubr.bf16.mxu0 %v212_v15 }
   0x2   :  { %v24_v2 = vsel %vm23_vm0, %v21_v0, 0.0  ;;  %v27_v3 = vsel %vm23_vm0, %v22_v1, 0.0  ;;  %v198_v16 = vld [vmem:[%s302_s3 + $0x30] ss:$8 sps:$4 sm:$0xff]   ;;  %141 = vmatprep.subr.bf16.mxu0 %v196_v14  ;;  %v199_v17 = vld [vmem:[%s302_s3 + $0x24] ss:$8 sps:$4 sm:$0xff]  }
   0x3   :  { %25 = vadd.xlane.f32.xlu0 %v24_v2  ;;  %142 = vmatpush1.bf16.msra.mxu0 %v198_v16  ;;  %v201_v18 = vld [vmem:[%s302_s3 + $0x20] ss:$8 sps:$4 sm:$0xff]   ;;  %v202_v19 = vld [vmem:[%s302_s3 + $0x14] ss:$8 sps:$4 sm:$0xff]   ;;  %v204_v20 = vld [vmem:[%s302_s3 + $0x10] ss:$8 sps:$4 sm:$0xff]  }
   0x4   :  { %143 = vmatprep.subr.bf16.mxu0 %v199_v17  ;;  %v205_v21 = vld [vmem:[%s302_s3 + $0x4] ss:$8 sps:$4 sm:$0xff]   ;;  %v207_v22 = vld [vmem:[%s302_s3] ss:$8 sps:$4 sm:$0xff]   ;;  %v81_v41 = vshrl.u32 %v80_v40, 7 }
   0x5   :  { %v184_v31 = vld [vmem:[%s303_s1] ss:$0 sm:$0xff] }
   0x6   :  { %v185_v35 = vld [vmem:[%s304_s2] ss:$0 sm:$0xff]  ;;  %v82_v42 = vsub.s32 0, %v81_v41  ;;  %v86_v44 = vsub.s32 1, %v81_v41 }
   0x7   :  { %28 = vadd.xlane.f32.xlu0 %v27_v3  ;;  %144 = vmatpush1.bf16.msra.mxu0 %v201_v18  ;;  %v78_v43 = vld [vmem:[%s305_s4] sm:$0x3] }
   0x8   :  { %145 = vmatprep.subr.bf16.mxu0 %v202_v19  ;;  %v83_v45 = vrot.slane %v78_v43, %v82_v42  ;;  %v87_v46 = vrot.slane %v78_v43, %v86_v44 }
   0xb   :  { %146 = vmatpush1.bf16.msra.mxu0 %v204_v20 }
   0xc   :  { %147 = vmatprep.subr.bf16.mxu0 %v205_v21 }
   0xf   :  { %148 = vmatpush1.bf16.msra.mxu0 %v207_v22 }
  0x8c   :  { %v26_v4 = vpop.xlane.xlu0 %25 }
  0x8d   :  { %v31_v5 = vmul.f32 0.015625, %v26_v4 }
  0x8f   :  { %v33_v6 = vsub.f32 %v21_v0, %v31_v5 }
  0x90   :  { %v29_v7 = vpop.xlane.xlu0 %28 }
  0x91   :  { %v32_v8 = vmul.f32 0.015625, %v29_v7  ;;  %v35_v9 = vmul.f32 %v33_v6, %v33_v6 }
  0x93   :  { %v34_v10 = vsub.f32 %v22_v1, %v32_v8  ;;  %v37_v11 = vsel %vm23_vm0, %v35_v9, 0.0 }
  0x94   :  { %38 = vadd.xlane.f32.xlu1 %v37_v11 }
  0x95   :  { %v36_v12 = vmul.f32 %v34_v10, %v34_v10 }
  0x97   :  { %v40_v13 = vsel %vm23_vm0, %v36_v12, 0.0 }
  0x98   :  { %41 = vadd.xlane.f32.xlu1 %v40_v13 }
 0x11d   :  { %v39_v23 = vpop.xlane.xlu1 %38 }
 0x11e   :  { %v43_v24 = vmul.f32 0.015625, %v39_v23 }
 0x120   :  { %v45_v25 = vadd.f32 1e-06, %v43_v24 }
 0x121   :  { %v42_v26 = vpop.xlane.xlu1 %41 }
 0x122   :  { %208 = vrsqrt.f32 %v45_v25  ;;  %v44_v27 = vmul.f32 0.015625, %v42_v26 }
 0x124   :  { %v46_v28 = vadd.f32 1e-06, %v44_v27 }
 0x126   :  { %210 = vrsqrt.f32 %v46_v28 }
 0x12f   :  { %v209_v29 = vpop.eup %208 }
 0x130   :  { %v49_v30 = vmul.f32 %v209_v29, %v33_v6 }
 0x132   :  { %v58_v34 = vmul.f32 %v184_v31, %v49_v30 }
 0x133   :  { %v211_v32 = vpop.eup %210 }
 0x134   :  { %v50_v33 = vmul.f32 %v211_v32, %v34_v10  ;;  %v67_v37 = vadd.f32 %v185_v35, %v58_v34 }
 0x136   :  { %v59_v36 = vmul.f32 %v184_v31, %v50_v33 }
 0x138   :  { %v68_v38 = vadd.f32 %v185_v35, %v59_v36 }
 0x13a   :  { %v69_v39 = vpack.c.bf16 %v68_v38, %v67_v37 }
 0x13c   :  { %194 = vmatmul.mubr.msk.bf16.vlgmr.msra.gmra.mxu0 %vm23_vm0, %v69_v39 }
 0x1fc   :  { %v167_v47 = vpop.f32.mrf.mxu0 }
 0x1fd   :  { %v168_v48 = vadd.f32 %v167_v47, %v83_v45 }
 0x1fe   :  { %v169_v49 = vpop.f32.mrf.mxu0 }
 0x1ff   :  { %176 = vst [vmem:[%s306_s5] sm:$0xff] %v168_v48  ;;  %v170_v50 = vadd.f32 %v169_v49, %v87_v46 }
 0x200   :  { %v171_v51 = vpop.f32.mrf.mxu0 }
 0x201   :  { %177 = vst.msk [vmem:[%s306_s5 + $0x8] sm:$0xff] %vm23_vm0, %v170_v50  ;;  %v172_v52 = vadd.f32 %v171_v51, %v83_v45 }
 0x202   :  { %v173_v53 = vpop.f32.mrf.mxu0 }
 0x203   :  { %178 = vst [vmem:[%s306_s5 + $0x10] sm:$0xff] %v172_v52  ;;  %v174_v54 = vadd.f32 %v173_v53, %v87_v46 }
 0x205   :  { %179 = vst.msk [vmem:[%s306_s5 + $0x18] sm:$0xff] %vm23_vm0, %v174_v54 }

// kernel: frozen_dinov2_encoder.12
= control target key start
LH: loop header
LB: loop body
LE: loop exit
PB: predicated region body
PF: predicated region fallthrough
CT: control target
= control target key end

     0   :  { %s780_s18 = smov 0   ;;  %s857_s0 = inlined_call_operand.vmem [shape: f32[2,5,192], index: 0, kind: input, shape index: {}]   ;;  %s858_s1 = inlined_call_operand.vmem [shape: f32[2,5,64], index: 1, kind: input, shape index: {}]   ;;  %s859_s2 = inlined_call_operand.vmem [shape: bf16[64,64], index: 2, kind: input, shape index: {}]   ;;  %s860_s3 = inlined_call_operand.vmem [shape: f32[1,64], index: 3, kind: input, shape index: {}]   ;;  %s861_s4 = inlined_call_operand.vmem [shape: f32[1,64], index: 4, kind: input, shape index: {}]   ;;  %s862_s5 = inlined_call_operand.vmem [shape: f32[2,5,64], index: 5, kind: output, shape index: {}]  }
   0x1 LB: > { %s638_s19 = sadd.s32 4294967295, %s742_s18   ;;  %p642_p0 = scmp.ge.s32.totalorder %s742_s18, 1  ;;  %s742_s18 = sphi %s780_s18, %s15_s18  }
   0x2   : > { %p196_p1 = scmp.lt.s32.totalorder %s742_s18, 3 }
   0x4   : > { %p197_p2 = pnand %p642_p0, %p196_p1 }
   0x5   : > { %p227_p3 = scmp.lt.s32.totalorder (!%p197_p2), %s638_s19, 1  ;;  %s746_s24 = smov (!%p197_p2), 64  }
   0x6   : > { %200 = sbr.rel (%p197_p2) target bundleno = 1168 (0x490), region = 40  ;;  %s747_s25 = smov (!%p197_p2), 96  }
   0x7   : > { %s748_s26 = smov (!%p197_p2), 32  }
   0xb   : > { %v744_v0 = vmov 0.0   ;;  %s864_s19 = smov (!%p227_p3, %s638_s19), 1  ;;  %vm745_vm0 = vmmov 0   ;;  %vm248_vm1 = vcmask 261120   ;;  %vm296_vm2 = vcmask 36864   ;;  %v724_v46 = vld [vmem:[%s859_s2 + $0x18] sm:$0xff]  }
   0xc   : > { %674 = vmatprep.subr.bf16.mxu0 %v744_v0  ;;  %686 = vmatprep.subr.bf16.mxu1 %v744_v0  ;;  %s660_s20 = sshll.u32 %s864_s19, 4  ;;  %vm313_vm3 = vcmask 1041408   ;;  %vm314_vm4 = vcmask 1042432   ;;  %v749_v22 = vmov 65535   ;;  %vm309_vm5 = vcmask 39936   ;;  %v725_v47 = vld [vmem:[%s859_s2 + $0x10] sm:$0xff]  }
   0xd   : > { %676 = vmatprep.mubr.msk.bf16.mxu0 %vm745_vm0, %v744_v0  ;;  %688 = vmatprep.mubr.msk.bf16.mxu1 %vm745_vm0, %v744_v0  ;;  %s800_s23 = scalar_lea.vmem %s857_s0, %s660_s20  ;;  %v315_v23 = vsel %vm313_vm3, 4294967295, %v749_v22  ;;  %v726_v48 = vld [vmem:[%s859_s2 + $0x8] sm:$0xff]   ;;  %v727_v49 = vld [vmem:[%s859_s2] sm:$0xff]   ;;  %vm517_vm6 = vcmask 523264   ;;  %s645_s10 = sshll.u32 %s864_s19, 3  ;;  %vm571_vm7 = vcmask 520192  }
   0xe   : > { %v241_v1 = vld [vmem:[%s800_s23] sm:$0x1f]  ;;  %v242_v20 = vld [vmem:[%s800_s23 + $0x8] sm:$0x1f]  ;;  %v316_v24 = vsel %vm314_vm4, %v315_v23, 0  ;;  %s235_s15 = scalar_lea.vmem %s858_s1, %s645_s10  ;;  %s239_s19 = scalar_lea.vmem %s862_s5, %s645_s10 }
   0xf   : > { %v243_v2 = vpack.c.bf16 %v241_v1, %v241_v1  ;;  %v244_v21 = vpack.c.bf16 %v242_v20, %v242_v20  ;;  %v651_v61 = vld [vmem:[%s860_s3] ss:$0 sm:$0xff] }
  0x10   : > { %v657_v63 = vld [vmem:[%s861_s4] ss:$0 sm:$0xff] }
  0x11   : > { %246 = vrot.lane.b32.xlu0 %v243_v2, %s746_s24  ;;  %360 = vrot.lane.b32.xlu1 %v243_v2, %s747_s25  ;;  %v318_v25 = vand.u32 %v316_v24, %v244_v21  ;;  %v561_v1 = vld [vmem:[%s235_s15] sm:$0x1f] }
  0x15   : > { %362 = vrot.lane.b32.xlu0 %v243_v2, %s748_s26 }
  0x83   : > { %v247_v3 = vpop.permute.xlu0 %246  ;;  %v361_v7 = vpop.permute.xlu1 %360 }
  0x84   : > { %v253_v4 = vsel %vm248_vm1, %v247_v3, 0 }
  0x85   : > { %675 = vmatpush3.bf16.xpose.msra.mxu0 %v253_v4 }
  0x86   : > { %680 = vmatprep.subr.bf16.mxu0 %v744_v0 }
  0x87   : > { %v363_v5 = vpop.permute.xlu0 %362 }
  0x88   : > { %v368_v6 = vsel %vm248_vm1, %v363_v5, 0 }
  0x89   : > { %687 = vmatpush3.bf16.xpose.msra.mxu1 %v368_v6 }
  0x8a   : > { %698 = vmatprep.subr.bf16.mxu1 %v744_v0 }
  0x8c   : > { %677 = vmatmul.mubr.msk.bf16.vlgmr.msra.gmra.mxu0 %vm248_vm1, %v243_v2 }
  0x8d   : > { %682 = vmatprep.mubr.msk.bf16.mxu0 %vm745_vm0, %v744_v0  ;;  %681 = vmatpush3.bf16.msra.mxu0 %v318_v25 }
  0x8e   : > { %692 = vmatprep.subr.bf16.mxu0 %v744_v0 }
  0x90   : > { %689 = vmatmul.mubr.msk.bf16.vlgmr.msra.gmra.mxu1 %vm248_vm1, %v361_v7 }
  0x91   : > { %706 = vmatprep.mubr.msk.bf16.mxu1 %vm745_vm0, %v744_v0  ;;  %699 = vmatpush3.bf16.msra.mxu1 %v724_v46 }
  0x92   : > { %700 = vmatprep.subr.bf16.mxu1 %v744_v0 }
  0x95   : > { %701 = vmatpush3.bf16.msra.mxu1 %v725_v47 }
  0x96   : > { %702 = vmatprep.subr.bf16.mxu1 %v744_v0 }
  0x99   : > { %703 = vmatpush3.bf16.msra.mxu1 %v726_v48 }
  0x9a   : > { %704 = vmatprep.subr.bf16.mxu1 %v744_v0 }
  0x9d   : > { %705 = vmatpush3.bf16.msra.mxu1 %v727_v49 }
 0x14c   : > { %v289_v8 = vpop.f32.mrf.mxu0 }
 0x14d   : > { %v295_v9 = vmul.f32 0.17677669, %v289_v8 }
 0x14e   : > { %v678_v10 = vpop.f32.mrf.mxu0 }
 0x14f   : > { %v297_v11 = vsel %vm296_vm2, %v295_v9, -inf }
 0x150   : > { %298 = vmax.xlane.f32.xlu1 %v297_v11  ;;  %v292_v12 = vpop.f32.mrf.mxu0  ;;  %v404_v13 = vpop.f32.mrf.mxu1 }
 0x151   : > { %v410_v14 = vmul.f32 0.17677669, %v404_v13 }
 0x152   : > { %v679_v15 = vpop.f32.mrf.mxu0  ;;  %v690_v16 = vpop.f32.mrf.mxu1 }
 0x153   : > { %v411_v17 = vsel %vm296_vm2, %v410_v14, -inf }
 0x154   : > { %412 = vmax.xlane.f32.xlu0 %v411_v17  ;;  %v407_v18 = vpop.f32.mrf.mxu1 }
 0x156   : > { %v691_v19 = vpop.f32.mrf.mxu1 }
 0x1d9   : > { %v299_v26 = vpop.xlane.xlu1 %298 }
 0x1da   : > { %v300_v27 = vsub.f32 %v295_v9, %v299_v26 }
 0x1dc   : > { %v301_v28 = vmul.f32 1.442695, %v300_v27 }
 0x1dd   : > { %v413_v29 = vpop.xlane.xlu0 %412 }
 0x1de   : > { %728 = vpow2.f32 %v301_v28  ;;  %v414_v30 = vsub.f32 %v410_v14, %v413_v29 }
 0x1e0   : > { %v415_v31 = vmul.f32 1.442695, %v414_v30 }
 0x1e2   : > { %730 = vpow2.f32 %v415_v31 }
 0x1eb   : > { %v729_v32 = vpop.eup %728 }
 0x1ec   : > { %v303_v33 = vsel %vm296_vm2, %v729_v32, 0.0 }
 0x1ed   : > { %304 = vadd.xlane.f32.xlu0 %v303_v33 }
 0x1ef   : > { %v731_v34 = vpop.eup %730 }
 0x1f0   : > { %v417_v35 = vsel %vm296_vm2, %v731_v34, 0.0 }
 0x1f1   : > { %418 = vadd.xlane.f32.xlu1 %v417_v35 }
 0x203   : > { %424 = vrot.lane.b32.xlu0 %v244_v21, %s747_s25 }
 0x276   : > { %v305_v36 = vpop.xlane.xlu0 %304 }
 0x277   : > { %732 = vrcp.f32 %v305_v36 }
 0x27a   : > { %v419_v37 = vpop.xlane.xlu1 %418  ;;  %v425_v38 = vpop.permute.xlu0 %424 }
 0x27b   : > { %734 = vrcp.f32 %v419_v37  ;;  %v430_v41 = vand.u32 %v425_v38, %v316_v24 }
 0x284   : > { %v733_v39 = vpop.eup %732 }
 0x285   : > { %v307_v40 = vmul.f32 %v733_v39, %v729_v32 }
 0x287   : > { %v308_v42 = vpack.c.bf16 %v307_v40, %v307_v40 }
 0x288   : > { %v735_v43 = vpop.eup %734 }
 0x289   : > { %683 = vmatmul.mubr.msk.bf16.vlgmr.msra.gmra.mxu0 %vm309_vm5, %v308_v42  ;;  %v421_v44 = vmul.f32 %v735_v43, %v731_v34 }
 0x28a   : > { %693 = vmatpush3.bf16.msra.mxu0 %v430_v41  ;;  %694 = vmatprep.mubr.msk.bf16.mxu0 %vm745_vm0, %v744_v0 }
 0x28b   : > { %v422_v45 = vpack.c.bf16 %v421_v44, %v421_v44 }
 0x291   : > { %695 = vmatmul.mubr.msk.bf16.vlgmr.msra.gmra.mxu0 %vm309_vm5, %v422_v45 }
 0x349   : > { %v354_v50 = vpop.f32.mrf.mxu0 }
 0x34b   : > { %v684_v51 = vpop.f32.mrf.mxu0 }
 0x34d   : > { %v357_v52 = vpop.f32.mrf.mxu0 }
 0x34f   : > { %v685_v53 = vpop.f32.mrf.mxu0 }
 0x351   : > { %v466_v54 = vpop.f32.mrf.mxu0 }
 0x352   : > { %473 = vrot.lane.b32.xlu1 %v466_v54, %s748_s26 }
 0x353   : > { %v696_v55 = vpop.f32.mrf.mxu0 }
 0x355   : > { %v469_v56 = vpop.f32.mrf.mxu0 }
 0x357   : > { %v697_v57 = vpop.f32.mrf.mxu0 }
 0x3c4   : > { %v474_v58 = vpop.permute.xlu1 %473 }
 0x3c5   : > { %v476_v59 = vsel %vm248_vm1, %v354_v50, %v474_v58 }
 0x3c6   : > { %v477_v60 = vpack.c.bf16 %v476_v59, %v476_v59 }
 0x3c8   : > { %707 = vmatmul.mubr.msk.bf16.vlgmr.msra.gmra.mxu1 %vm517_vm6, %v477_v60 }
 0x488   : > { %v555_v62 = vpop.f32.mrf.mxu1 }
 0x489   : > { %v556_v0 = vadd.f32 %v651_v61, %v555_v62 }
 0x48a   : > { %v708_v2 = vpop.f32.mrf.mxu1 }
 0x48b   : > { %v569_v3 = vmul.f32 %v657_v63, %v556_v0 }
 0x48c   : > { %v558_v4 = vpop.f32.mrf.mxu1 }
 0x48d   : > { %v570_v5 = vadd.f32 %v569_v3, %v561_v1 }
 0x48e   : > { %v709_v6 = vpop.f32.mrf.mxu1 }
 0x48f   : > { %572 = vst.msk [vmem:[%s239_s19] sm:$0x1f] %vm571_vm7, %v570_v5 }
 0x490 PF: > { %s15_s18 = sadd.s32 1, %s742_s18  }
 0x491   : > { %p12_p4 = scmp.ge.s32.totalorder %s15_s18, 4  }
 0x493   :  { %14 = sbr.rel (!%p12_p4) target bundleno = 1 (0x1), region = 73 }

// kernel: frozen_dinov2_encoder.17
= control target key start
LH: loop header
LB: loop body
LE: loop exit
PB: predicated region body
PF: predicated region fallthrough
CT: control target
= control target key end

     0   :  { %vm23_vm0 = vcmask 523264   ;;  %v194_v14 = vmov 0.0   ;;  %vm195_vm1 = vmmov 0   ;;  %s266_s0 = inlined_call_operand.vmem [shape: f32[16,64], index: 0, kind: input, shape index: {}]   ;;  %s267_s3 = inlined_call_operand.vmem [shape: bf16[64,64], index: 3, kind: input, shape index: {}]   ;;  %s268_s1 = inlined_call_operand.vmem [shape: f32[1,64], index: 1, kind: input, shape index: {}]   ;;  %s269_s2 = inlined_call_operand.vmem [shape: f32[1,64], index: 2, kind: input, shape index: {}]   ;;  %s270_s4 = inlined_call_operand.vmem [shape: f32[1,64], index: 4, kind: input, shape index: {}]   ;;  %s271_s5 = inlined_call_operand.vmem [shape: f32[16,64], index: 5, kind: output, shape index: {}]  }
   0x1   :  { %v21_v0 = vld [vmem:[%s266_s0] sm:$0xff]  ;;  %v22_v1 = vld [vmem:[%s266_s0 + $0x8] sm:$0xff]  ;;  %172 = vmatprep.subr.bf16.mxu0 %v194_v14  ;;  %v186_v15 = vld [vmem:[%s267_s3 + $0x18] sm:$0xff]   ;;  %180 = vmatprep.mubr.msk.bf16.mxu0 %vm195_vm1, %v194_v14 }
   0x2   :  { %v24_v2 = vsel %vm23_vm0, %v21_v0, 0.0  ;;  %v27_v3 = vsel %vm23_vm0, %v22_v1, 0.0  ;;  %173 = vmatpush3.bf16.msra.mxu0 %v186_v15  ;;  %v187_v16 = vld [vmem:[%s267_s3 + $0x10] sm:$0xff]   ;;  %v188_v17 = vld [vmem:[%s267_s3 + $0x8] sm:$0xff]   ;;  %v189_v18 = vld [vmem:[%s267_s3] sm:$0xff]  }
   0x3   :  { %25 = vadd.xlane.f32.xlu0 %v24_v2  ;;  %174 = vmatprep.subr.bf16.mxu0 %v194_v14  ;;  %v159_v27 = vld [vmem:[%s268_s1] ss:$0 sm:$0xff] }
   0x4   :  { %v160_v31 = vld [vmem:[%s269_s2] ss:$0 sm:$0xff] }
   0x5   :  { %v161_v36 = vld [vmem:[%s270_s4] ss:$0 sm:$0xff] }
   0x6   :  { %175 = vmatpush3.bf16.msra.mxu0 %v187_v16 }
   0x7   :  { %28 = vadd.xlane.f32.xlu0 %v27_v3  ;;  %176 = vmatprep.subr.bf16.mxu0 %v194_v14 }
   0xa   :  { %177 = vmatpush3.bf16.msra.mxu0 %v188_v17 }
   0xb   :  { %178 = vmatprep.subr.bf16.mxu0 %v194_v14 }
   0xe   :  { %179 = vmatpush3.bf16.msra.mxu0 %v189_v18 }
  0x8c   :  { %v26_v4 = vpop.xlane.xlu0 %25 }
  0x8d   :  { %v31_v5 = vmul.f32 0.015625, %v26_v4 }
  0x8f   :  { %v33_v6 = vsub.f32 %v21_v0, %v31_v5 }
  0x90   :  { %v29_v7 = vpop.xlane.xlu0 %28 }
  0x91   :  { %v32_v8 = vmul.f32 0.015625, %v29_v7  ;;  %v35_v9 = vmul.f32 %v33_v6, %v33_v6 }
  0x93   :  { %v34_v10 = vsub.f32 %v22_v1, %v32_v8  ;;  %v37_v11 = vsel %vm23_vm0, %v35_v9, 0.0 }
  0x94   :  { %38 = vadd.xlane.f32.xlu1 %v37_v11 }
  0x95   :  { %v36_v12 = vmul.f32 %v34_v10, %v34_v10 }
  0x97   :  { %v40_v13 = vsel %vm23_vm0, %v36_v12, 0.0 }
  0x98   :  { %41 = vadd.xlane.f32.xlu1 %v40_v13 }
 0x11d   :  { %v39_v19 = vpop.xlane.xlu1 %38 }
 0x11e   :  { %v43_v20 = vmul.f32 0.015625, %v39_v19 }
 0x120   :  { %v45_v21 = vadd.f32 1e-06, %v43_v20 }
 0x121   :  { %v42_v22 = vpop.xlane.xlu1 %41 }
 0x122   :  { %190 = vrsqrt.f32 %v45_v21  ;;  %v44_v23 = vmul.f32 0.015625, %v42_v22 }
 0x124   :  { %v46_v24 = vadd.f32 1e-06, %v44_v23 }
 0x126   :  { %192 = vrsqrt.f32 %v46_v24 }
 0x12f   :  { %v191_v25 = vpop.eup %190 }
 0x130   :  { %v49_v26 = vmul.f32 %v191_v25, %v33_v6 }
 0x132   :  { %v58_v30 = vmul.f32 %v159_v27, %v49_v26 }
 0x133   :  { %v193_v28 = vpop.eup %192 }
 0x134   :  { %v50_v29 = vmul.f32 %v193_v28, %v34_v10  ;;  %v67_v33 = vadd.f32 %v160_v31, %v58_v30 }
 0x136   :  { %v59_v32 = vmul.f32 %v159_v27, %v50_v29 }
 0x138   :  { %v68_v34 = vadd.f32 %v160_v31, %v59_v32 }
 0x13a   :  { %v69_v35 = vpack.c.bf16 %v68_v34, %v67_v33 }
 0x13c   :  { %181 = vmatmul.mubr.msk.bf16.vlgmr.msra.gmra.mxu0 %vm23_vm0, %v69_v35 }
 0x1fc   :  { %v146_v37 = vpop.f32.mrf.mxu0 }
 0x1fd   :  { %v147_v38 = vadd.f32 %v161_v36, %v146_v37 }
 0x1fe   :  { %v182_v39 = vpop.f32.mrf.mxu0 }
 0x1ff   :  { %153 = vst.msk [vmem:[%s271_s5] sm:$0xff] %vm23_vm0, %v147_v38 }
 0x200   :  { %v149_v40 = vpop.f32.mrf.mxu0 }
 0x201   :  { %v150_v41 = vadd.f32 %v161_v36, %v149_v40 }
 0x202   :  { %v183_v42 = vpop.f32.mrf.mxu0 }
 0x203   :  { %154 = vst.msk [vmem:[%s271_s5 + $0x8] sm:$0xff] %vm23_vm0, %v150_v41 }

// kernel: frozen_dinov2_encoder.13
= control target key start
LH: loop header
LB: loop body
LE: loop exit
PB: predicated region body
PF: predicated region fallthrough
CT: control target
= control target key end

     0   :  { %vm32_vm0 = vcmask 523264   ;;  %v508_v15 = vmov 0   ;;  %v89_v56 = vlaneseq  ;;  %s670_s0 = inlined_call_operand.vmem [shape: f32[16,64], index: 0, kind: input, shape index: {}]   ;;  %s671_s3 = inlined_call_operand.vmem [shape: bf16[64,256], index: 3, kind: input, shape index: {}]   ;;  %s672_s1 = inlined_call_operand.vmem [shape: f32[1,64], index: 1, kind: input, shape index: {}]   ;;  %s673_s2 = inlined_call_operand.vmem [shape: f32[1,64], index: 2, kind: input, shape index: {}]   ;;  %s674_s5 = inlined_call_operand.vmem [shape: bf16[256,64], index: 5, kind: input, shape index: {}]   ;;  %s675_s4 = inlined_call_operand.vmem [shape: f32[1,256], index: 4, kind: input, shape index: {}]   ;;  %s676_s6 = inlined_call_operand.vmem [shape: f32[1,64], index: 6, kind: input, shape index: {}]   ;;  %s677_s7 = inlined_call_operand.vmem [shape: f32[1,64], index: 7, kind: input, shape index: {}]   ;;  %s678_s8 = inlined_call_operand.vmem [shape: f32[16,64], index: 8, kind: output, shape index: {}]  }
   0x1   :  { %v557_v0 = vld [vmem:[%s670_s0] sm:$0xff]  ;;  %v562_v1 = vld [vmem:[%s670_s0 + $0x8] sm:$0xff]  ;;  %v468_v14 = vld [vmem:[%s671_s3 + $0x34] ss:$8 sps:$4 sm:$0xff]   ;;  %174 = vmatprep.mubr.bf16.mxu0 %v508_v15 }
   0x2   :  { %v33_v2 = vsel %vm32_vm0, %v557_v0, 0.0  ;;  %v36_v3 = vsel %vm32_vm0, %v562_v1, 0.0  ;;  %v470_v16 = vld [vmem:[%s671_s3 + $0x30] ss:$8 sps:$4 sm:$0xff]   ;;  %150 = vmatprep.subr.bf16.mxu0 %v468_v14  ;;  %v471_v17 = vld [vmem:[%s671_s3 + $0x24] ss:$8 sps:$4 sm:$0xff]  }
   0x3   :  { %34 = vadd.xlane.f32.xlu0 %v33_v2  ;;  %151 = vmatpush1.bf16.msra.mxu0 %v470_v16  ;;  %v473_v18 = vld [vmem:[%s671_s3 + $0x20] ss:$8 sps:$4 sm:$0xff]   ;;  %v474_v19 = vld [vmem:[%s671_s3 + $0x14] ss:$8 sps:$4 sm:$0xff]   ;;  %v476_v20 = vld [vmem:[%s671_s3 + $0x10] ss:$8 sps:$4 sm:$0xff]  }
   0x4   :  { %152 = vmatprep.subr.bf16.mxu0 %v471_v17  ;;  %v477_v21 = vld [vmem:[%s671_s3 + $0x4] ss:$8 sps:$4 sm:$0xff]   ;;  %v479_v22 = vld [vmem:[%s671_s3] ss:$8 sps:$4 sm:$0xff]   ;;  %v480_v40 = vld [vmem:[%s674_s5 + $0x78] sm:$0xff]   ;;  %v90_v57 = vshrl.u32 %v89_v56, 7 }
   0x5   :  { %v416_v31 = vld [vmem:[%s672_s1] ss:$0 sm:$0xff]  ;;  %v481_v41 = vld [vmem:[%s674_s5 + $0x38] sm:$0xff]   ;;  %445 = vmatprep.subr.bf16.mxu1 %v480_v40  ;;  %v482_v42 = vld [vmem:[%s674_s5 + $0x70] sm:$0xff]  }
   0x6   :  { %v417_v35 = vld [vmem:[%s673_s2] ss:$0 sm:$0xff]  ;;  %446 = vmatpush3.bf16.msra.mxu1 %v481_v41  ;;  %v483_v43 = vld [vmem:[%s674_s5 + $0x30] sm:$0xff]   ;;  %v484_v44 = vld [vmem:[%s674_s5 + $0x68] sm:$0xff]   ;;  %v91_v58 = vsub.s32 0, %v90_v57  ;;  %v95_v60 = vsub.s32 1, %v90_v57 }
   0x7   :  { %37 = vadd.xlane.f32.xlu0 %v36_v3  ;;  %153 = vmatpush1.bf16.msra.mxu0 %v473_v18  ;;  %v485_v45 = vld [vmem:[%s674_s5 + $0x28] sm:$0xff]   ;;  %v486_v46 = vld [vmem:[%s674_s5 + $0x60] sm:$0xff]   ;;  %v488_v48 = vld [vmem:[%s674_s5 + $0x58] sm:$0xff]  }
   0x8   :  { %154 = vmatprep.subr.bf16.mxu0 %v474_v19  ;;  %447 = vmatprep.subr.bf16.mxu1 %v482_v42  ;;  %v487_v47 = vld [vmem:[%s674_s5 + $0x20] sm:$0xff]   ;;  %v489_v49 = vld [vmem:[%s674_s5 + $0x18] sm:$0xff]   ;;  %v490_v50 = vld [vmem:[%s674_s5 + $0x50] sm:$0xff]  }
   0x9   :  { %v491_v51 = vld [vmem:[%s674_s5 + $0x10] sm:$0xff]   ;;  %v492_v52 = vld [vmem:[%s674_s5 + $0x48] sm:$0xff]   ;;  %v494_v54 = vld [vmem:[%s674_s5 + $0x40] sm:$0xff]  }
   0xa   :  { %448 = vmatpush3.bf16.msra.mxu1 %v483_v43  ;;  %v493_v53 = vld [vmem:[%s674_s5 + $0x8] sm:$0xff]   ;;  %v495_v55 = vld [vmem:[%s674_s5] sm:$0xff]  }
   0xb   :  { %155 = vmatpush1.bf16.msra.mxu0 %v476_v20  ;;  %449 = vmatprep.subr.bf16.mxu1 %v484_v44  ;;  %v87_v59 = vld [vmem:[%s675_s4] sm:$0x3] }
   0xc   :  { %156 = vmatprep.subr.bf16.mxu0 %v477_v21  ;;  %v92_v61 = vrot.slane %v87_v59, %v91_v58  ;;  %v96_v62 = vrot.slane %v87_v59, %v95_v60 }
   0xe   :  { %450 = vmatpush3.bf16.msra.mxu1 %v485_v45 }
   0xf   :  { %157 = vmatpush1.bf16.msra.mxu0 %v479_v22  ;;  %451 = vmatprep.subr.bf16.mxu1 %v486_v46 }
  0x12   :  { %452 = vmatpush3.bf16.msra.mxu1 %v487_v47 }
  0x13   :  { %453 = vmatprep.subr.bf16.mxu1 %v488_v48  ;;  %v427_v48 = vld [vmem:[%s676_s6] ss:$0 sm:$0xff] }
  0x16   :  { %454 = vmatpush3.bf16.msra.mxu1 %v489_v49 }
  0x17   :  { %455 = vmatprep.subr.bf16.mxu1 %v490_v50 }
  0x1a   :  { %456 = vmatpush3.bf16.msra.mxu1 %v491_v51  ;;  %v444_v51 = vld [vmem:[%s677_s7] ss:$0 sm:$0xff] }
  0x1b   :  { %457 = vmatprep.subr.bf16.mxu1 %v492_v52 }
  0x1e   :  { %458 = vmatpush3.bf16.msra.mxu1 %v493_v53 }
  0x1f   :  { %459 = vmatprep.subr.bf16.mxu1 %v494_v54 }
  0x22   :  { %460 = vmatpush3.bf16.msra.mxu1 %v495_v55 }
  0x8c   :  { %v35_v4 = vpop.xlane.xlu0 %34 }
  0x8d   :  { %v40_v5 = vmul.f32 0.015625, %v35_v4 }
  0x8f   :  { %v42_v6 = vsub.f32 %v557_v0, %v40_v5 }
  0x90   :  { %v38_v7 = vpop.xlane.xlu0 %37 }
  0x91   :  { %v41_v8 = vmul.f32 0.015625, %v38_v7  ;;  %v44_v9 = vmul.f32 %v42_v6, %v42_v6 }
  0x93   :  { %v43_v10 = vsub.f32 %v562_v1, %v41_v8  ;;  %v46_v11 = vsel %vm32_vm0, %v44_v9, 0.0 }
  0x94   :  { %47 = vadd.xlane.f32.xlu1 %v46_v11 }
  0x95   :  { %v45_v12 = vmul.f32 %v43_v10, %v43_v10 }
  0x97   :  { %v49_v13 = vsel %vm32_vm0, %v45_v12, 0.0 }
  0x98   :  { %50 = vadd.xlane.f32.xlu1 %v49_v13 }
 0x11d   :  { %v48_v23 = vpop.xlane.xlu1 %47 }
 0x11e   :  { %v52_v24 = vmul.f32 0.015625, %v48_v23 }
 0x120   :  { %v54_v25 = vadd.f32 1e-06, %v52_v24 }
 0x121   :  { %v51_v26 = vpop.xlane.xlu1 %50 }
 0x122   :  { %496 = vrsqrt.f32 %v54_v25  ;;  %v53_v27 = vmul.f32 0.015625, %v51_v26 }
 0x124   :  { %v55_v28 = vadd.f32 1e-06, %v53_v27 }
 0x126   :  { %498 = vrsqrt.f32 %v55_v28 }
 0x12f   :  { %v497_v29 = vpop.eup %496 }
 0x130   :  { %v58_v30 = vmul.f32 %v497_v29, %v42_v6 }
 0x132   :  { %v67_v34 = vmul.f32 %v416_v31, %v58_v30 }
 0x133   :  { %v499_v32 = vpop.eup %498 }
 0x134   :  { %v59_v33 = vmul.f32 %v499_v32, %v43_v10  ;;  %v76_v37 = vadd.f32 %v417_v35, %v67_v34 }
 0x136   :  { %v68_v36 = vmul.f32 %v416_v31, %v59_v33 }
 0x138   :  { %v77_v38 = vadd.f32 %v417_v35, %v68_v36 }
 0x13a   :  { %v78_v39 = vpack.c.bf16 %v77_v38, %v76_v37 }
 0x13c   :  { %426 = vmatmul.mubr.msk.bf16.vlgmr.msra.gmra.mxu0 %vm32_vm0, %v78_v39 }
 0x1fc   :  { %v176_v63 = vpop.f32.mrf.mxu0 }
 0x1fd   :  { %v177_v2 = vadd.f32 %v176_v63, %v92_v61 }
 0x1fe   :  { %v178_v3 = vpop.f32.mrf.mxu0 }
 0x1ff   :  { %v185_v4 = vmul.f32 %v177_v2, %v177_v2  ;;  %v179_v5 = vadd.f32 %v178_v3, %v96_v62 }
 0x200   :  { %v180_v6 = vpop.f32.mrf.mxu0 }
 0x201   :  { %v189_v7 = vmul.f32 %v185_v4, %v177_v2  ;;  %v186_v8 = vmul.f32 %v179_v5, %v179_v5  ;;  %v181_v9 = vadd.f32 %v180_v6, %v92_v61 }
 0x202   :  { %v182_v10 = vpop.f32.mrf.mxu0 }
 0x203   :  { %v193_v11 = vmul.f32 0.044715, %v189_v7  ;;  %v190_v12 = vmul.f32 %v186_v8, %v179_v5  ;;  %v187_v13 = vmul.f32 %v181_v9, %v181_v9  ;;  %v183_v14 = vadd.f32 %v182_v10, %v96_v62 }
 0x205   :  { %v197_v15 = vadd.f32 %v193_v11, %v177_v2  ;;  %v194_v16 = vmul.f32 0.044715, %v190_v12  ;;  %v191_v17 = vmul.f32 %v187_v13, %v181_v9  ;;  %v188_v18 = vmul.f32 %v183_v14, %v183_v14 }
 0x207   :  { %v201_v19 = vmul.f32 0.7978846, %v197_v15  ;;  %v198_v20 = vadd.f32 %v194_v16, %v179_v5  ;;  %v195_v21 = vmul.f32 0.044715, %v191_v17  ;;  %v192_v22 = vmul.f32 %v188_v18, %v183_v14 }
 0x209   :  { %v199_v23 = vadd.f32 %v195_v21, %v181_v9  ;;  %v196_v24 = vmul.f32 0.044715, %v192_v22  ;;  %v202_v25 = vmul.f32 0.7978846, %v198_v20  ;;  %500 = vtanh.f32 %v201_v19 }
 0x20b   :  { %v203_v26 = vmul.f32 0.7978846, %v199_v23  ;;  %v200_v27 = vadd.f32 %v196_v24, %v183_v14  ;;  %502 = vtanh.f32 %v202_v25 }
 0x20d   :  { %504 = vtanh.f32 %v203_v26  ;;  %v204_v28 = vmul.f32 0.7978846, %v200_v27 }
 0x20f   :  { %506 = vtanh.f32 %v204_v28 }
 0x216   :  { %v501_v29 = vpop.eup %500 }
 0x217   :  { %v209_v33 = vadd.f32 1.0, %v501_v29 }
 0x218   :  { %v503_v30 = vpop.eup %502 }
 0x219   :  { %v210_v31 = vadd.f32 1.0, %v503_v30  ;;  %v213_v39 = vmul.f32 0.5, %v209_v33 }
 0x21a   :  { %v505_v32 = vpop.eup %504 }
 0x21b   :  { %v211_v34 = vadd.f32 1.0, %v505_v32  ;;  %v214_v37 = vmul.f32 0.5, %v210_v31  ;;  %v217_v44 = vmul.f32 %v213_v39, %v177_v2 }
 0x21c   :  { %v507_v35 = vpop.eup %506 }
 0x21d   :  { %v212_v36 = vadd.f32 1.0, %v507_v35  ;;  %v215_v38 = vmul.f32 0.5, %v211_v34  ;;  %v218_v42 = vmul.f32 %v214_v37, %v179_v5 }
 0x21f   :  { %v216_v40 = vmul.f32 0.5, %v212_v36  ;;  %v219_v41 = vmul.f32 %v215_v38, %v181_v9 }
 0x221   :  { %v220_v43 = vmul.f32 %v216_v40, %v183_v14  ;;  %v221_v46 = vpack.c.bf16 %v219_v41, %v217_v44 }
 0x223   :  { %v222_v45 = vpack.c.bf16 %v220_v43, %v218_v42 }
 0x225   :  { %390 = vmatprep.mubr.bf16.mxu1 %v222_v45 }
 0x226   :  { %391 = vmatmul.mubr.bf16.vlgmr.msra.gmra.mxu1 %v221_v46 }
 0x2e6   :  { %v461_v47 = vpop.f32.mrf.mxu1 }
 0x2e8   :  { %v462_v49 = vpop.f32.mrf.mxu1 }
 0x2e9   :  { %v463_v50 = vadd.f32 %v462_v49, %v461_v47 }
 0x2ea   :  { %v464_v52 = vpop.f32.mrf.mxu1 }
 0x2eb   :  { %v393_v53 = vadd.f32 %v463_v50, %v427_v48 }
 0x2ec   :  { %v465_v54 = vpop.f32.mrf.mxu1 }
 0x2ed   :  { %v406_v55 = vmul.f32 %v444_v51, %v393_v53  ;;  %v466_v56 = vadd.f32 %v465_v54, %v464_v52 }
 0x2ef   :  { %v408_v57 = vadd.f32 %v406_v55, %v557_v0  ;;  %v396_v58 = vadd.f32 %v466_v56, %v427_v48 }
 0x2f1   :  { %410 = vst.msk [vmem:[%s678_s8] sm:$0xff] %vm32_vm0, %v408_v57  ;;  %v407_v59 = vmul.f32 %v444_v51, %v396_v58 }
 0x2f3   :  { %v409_v60 = vadd.f32 %v407_v59, %v562_v1 }
 0x2f5   :  { %411 = vst.msk [vmem:[%s678_s8 + $0x8] sm:$0xff] %vm32_vm0, %v409_v60 }

</bundles_post_ra>
